<compile_context>
chip_gen: v6e
topology: v6e:2x2x1
jax: 0.10.0
libtpu: 0.0.40
codegen_flags: <defaults>
</compile_context>

<pallas_src>
import functools

import jax
import jax.numpy as jnp
import numpy as np
from jax.experimental import pallas as pl
from jax.experimental.pallas import tpu as pltpu

THRESH = 0.5
DECAY = 0.8


# ----------------------------- Pallas kernel -------------------------------

def _fused_block_kernel(x_ref, c1m_ref, c1s_ref, c2m_ref, c2s_ref,
                        w1_ref, b1_ref, w2_ref, b2_ref, mask_ref,
                        c1m_out, c1s_out, c2m_out, c2s_out,
                        slab_ref, kslab_ref,
                        *, b_imgs, cin, cout, hw, w, pad, guard):
    """Process b_imgs images per grid step.

    x_ref / c*_ref:   (b_imgs*C, H*W)  dense, image-major rows (free reshape of NCHW)
    w*_ref:           (Cout, 9*Cin)    weight columns ordered (kh, kw, ci)
    b*_ref:           (Cout, 1)
    mask_ref:         (3, b_imgs*P)    rows: m_minus, m_plus, central
    slab_ref:         (C, Wi)          flat zero-margined channel-major image slab
    kslab_ref:        (9*C, Wo)        im2col-style window slab (built in VMEM)
    with P = hw + 2*pad, Wo = b_imgs*P, Wi = Wo + 2*guard.
    """
    f32 = jnp.float32
    P = hw + 2 * pad
    Wo = b_imgs * P

    m_minus = mask_ref[0:1, :]      # (1, Wo) zero where out-col wraps left
    m_plus = mask_ref[1:2, :]       # (1, Wo) zero where out-col wraps right
    central = mask_ref[2:3, :]      # (1, Wo) 1 inside each image, 0 in margins

    def fill_kslab(c):
        # kslab rows [t*c, (t+1)*c) = source window for tap t (dw-masked).
        for t in range(9):
            dh, dw = t // 3 - 1, t % 3 - 1
            s = dh * w + dw
            win = slab_ref[:, guard + s: guard + s + Wo]      # (c, Wo)
            if dw == -1:
                win = win * m_minus
            elif dw == 1:
                win = win * m_plus
            kslab_ref[t * c:(t + 1) * c, :] = win

    def to_dense(y):
        # (Cout, Wo) channel-major -> (b_imgs*Cout, hw) image-major valid cols.
        return jnp.concatenate(
            [y[:, b * P + pad: b * P + pad + hw] for b in range(b_imgs)],
            axis=0)

    # ---- build flat zero-margined input slab from the dense x block --------
    slab_ref[...] = jnp.zeros_like(slab_ref)
    x_dense = x_ref[...]                                      # (b_imgs*cin, hw)
    for b in range(b_imgs):
        slab_ref[:, guard + b * P + pad: guard + b * P + pad + hw] = \
            x_dense[b * cin:(b + 1) * cin, :]

    # ---- conv1: single (Cout, 9*Cin) @ (9*Cin, Wo) matmul -------------------
    fill_kslab(cin)
    conv1 = (jnp.dot(w1_ref[...], kslab_ref[...],
                     preferred_element_type=f32) + b1_ref[...]) * central

    # ---- membrane update for c1 (dense, full-sublane layout) ---------------
    conv1_dense = to_dense(conv1)
    c1m_new = c1m_ref[...] * DECAY * (1.0 - c1s_ref[...]) + conv1_dense
    c1s_new = (c1m_new > THRESH).astype(f32)
    c1m_out[...] = c1m_new
    c1s_out[...] = c1s_new

    # ---- conv2 reads conv1's flat-padded output (margins already zero) -----
    slab_ref[:, guard: guard + Wo] = conv1
    fill_kslab(cout)
    conv2 = jnp.dot(w2_ref[...], kslab_ref[...],
                    preferred_element_type=f32) + b2_ref[...]

    # ---- residual (= x, dense layout matches) + membrane update for c2 -----
    out2_dense = to_dense(conv2) + x_dense
    c2m_new = c2m_ref[...] * DECAY * (1.0 - c2s_ref[...]) + out2_dense
    c2s_new = (c2m_new > THRESH).astype(f32)
    c2m_out[...] = c2m_new
    c2s_out[...] = c2s_new


# ----------------------------- wrapper / glue -------------------------------

def _pick_block_batch(n, max_b=8):
    for cand in range(min(n, max_b), 0, -1):
        if n % cand == 0:
            return cand
    return 1


def spiking_basic_block(x, c1_mem, c1_spike, c2_mem, c2_spike, params):
    """Forward pass of SpikingBasicBlock.  All tensors NCHW float32."""
    w1, b1, w2, b2 = params["w1"], params["b1"], params["w2"], params["b2"]
    n, cin, h, w = x.shape
    cout = w1.shape[0]
    assert cin == cout, "stride=1 / downsample=None path requires inplanes==planes"
    hw = h * w
    f32 = jnp.float32

    bi = _pick_block_batch(n)          # images per grid step
    pad = w + 16                       # per-image flat zero margin (>= w+1)
    guard = pad                        # global guard so tap slices stay in-bounds
    P = hw + 2 * pad
    Wo = bi * P
    Wi = Wo + 2 * guard

    # NCHW -> (N*C, H*W) is a free (contiguous) reshape: full sublane density.
    def dense(t):
        return t.reshape(n * cout, hw).astype(f32)

    x_d = x.reshape(n * cin, hw).astype(f32)

    # PyTorch conv weight (Cout, Cin, 3, 3) -> (Cout, 9*Cin), columns ordered
    # (kh, kw, ci) to match the kslab row order (t = kh*3 + kw).
    w1_mat = jnp.transpose(w1, (0, 2, 3, 1)).reshape(cout, 9 * cin).astype(f32)
    w2_mat = jnp.transpose(w2, (0, 2, 3, 1)).reshape(cout, 9 * cout).astype(f32)
    b1_col = b1.reshape(cout, 1).astype(f32)
    b2_col = b2.reshape(cout, 1).astype(f32)

    # Precomputed lane masks (batch-invariant, VMEM-resident across steps).
    cols = np.arange(Wo)
    off = cols % P
    sp = off - pad
    wc = np.mod(sp, w)
    m_minus = (wc >= 1).astype(np.float32)
    m_plus = (wc <= w - 2).astype(np.float32)
    central = ((off >= pad) & (off < pad + hw)).astype(np.float32)
    masks = jnp.asarray(np.stack([m_minus, m_plus, central], axis=0))  # (3, Wo)

    kernel = functools.partial(_fused_block_kernel, b_imgs=bi, cin=cin,
                               cout=cout, hw=hw, w=w, pad=pad, guard=guard)

    img_spec = pl.BlockSpec((bi * cout, hw), lambda i: (i, 0))
    const2 = lambda i: (0, 0)
    grid_spec = pltpu.PrefetchScalarGridSpec(
        num_scalar_prefetch=0,
        grid=(n // bi,),
        in_specs=[
            pl.BlockSpec((bi * cin, hw), lambda i: (i, 0)),     # x (dense)
            img_spec, img_spec, img_spec, img_spec,             # c1/c2 mem & spike
            pl.BlockSpec((cout, 9 * cin), const2),              # w1   (resident)
            pl.BlockSpec((cout, 1), const2),                    # b1   (resident)
            pl.BlockSpec((cout, 9 * cout), const2),             # w2   (resident)
            pl.BlockSpec((cout, 1), const2),                    # b2   (resident)
            pl.BlockSpec((3, Wo), const2),                      # masks (resident)
        ],
        out_specs=(img_spec, img_spec, img_spec, img_spec),
        scratch_shapes=[pltpu.VMEM((cin, Wi), f32),             # image / conv1 slab
                        pltpu.VMEM((9 * cin, Wo), f32)],        # window slab
    )

    flops = (2 * cout * 9 * cin * n * P          # conv1 (incl. masked margins)
             + 2 * cout * 9 * cout * n * P       # conv2
             + 12 * n * cout * hw)               # membrane updates
    bytes_accessed = 4 * (n * cin * hw + 8 * n * cout * hw
                          + 9 * cin * cout + 9 * cout * cout + 2 * cout + 3 * Wo)

    outs = pl.pallas_call(
        kernel,
        grid_spec=grid_spec,
        out_shape=tuple(jax.ShapeDtypeStruct((n * cout, hw), f32) for _ in range(4)),
        # Alias the 4 state inputs (operands 1..4) to the 4 state outputs.
        input_output_aliases={1: 0, 2: 1, 3: 2, 4: 3},
        compiler_params=pltpu.CompilerParams(
            dimension_semantics=("parallel",)),
        cost_estimate=pl.CostEstimate(flops=flops, transcendentals=0,
                                      bytes_accessed=bytes_accessed),
    )(x_d, dense(c1_mem), dense(c1_spike), dense(c2_mem), dense(c2_spike),
      w1_mat, b1_col, w2_mat, b2_col, masks)

    c1_mem_new, c1_spike_new, c2_mem_new, c2_spike_new = outs

    def unflat(t):  # (N*C, H*W) -> NCHW (free reshape)
        return t.reshape(n, cout, h, w)

    # TODO(synk): nn.Dropout(0.2) implemented as inference-mode identity
    # (training-mode random masking / 1/(1-p) scaling not applied).
    return (unflat(c2_spike_new), unflat(c1_mem_new), unflat(c1_spike_new),
            unflat(c2_mem_new), unflat(c2_spike_new))


# ----------------------------- reference (checking only) -------------------

def _ref_forward(x, c1_mem, c1_spike, c2_mem, c2_spike, params):
    def conv(inp, w, b):
        y = jax.lax.conv_general_dilated(
            inp, w, window_strides=(1, 1), padding="SAME",
            dimension_numbers=("NCHW", "OIHW", "NCHW"))
        return y + b[None, :, None, None]

    out = conv(x, params["w1"], params["b1"])
    c1_mem = c1_mem * DECAY * (1.0 - c1_spike) + out
    c1_spike = (c1_mem > THRESH).astype(jnp.float32)
    out2 = conv(out, params["w2"], params["b2"]) + x
    c2_mem = c2_mem * DECAY * (1.0 - c2_spike) + out2
    c2_spike = (c2_mem > THRESH).astype(jnp.float32)
    return c2_spike, c1_mem, c1_spike, c2_mem, c2_spike


# ----------------------------- main ----------------------------------------

if __name__ == "__main__":
    # Small shapes consistent with the module: batch=2, inplanes=planes=4,
    # image_size=(16,16), stride=1, downsample=None.
    N, C, H, W = 2, 4, 16, 16
    key = jax.random.PRNGKey(0)
    ks = jax.random.split(key, 9)

    fan_in = 3 * 3 * C
    params = {
        "w1": jax.random.normal(ks[0], (C, C, 3, 3), jnp.float32) / np.sqrt(fan_in),
        "b1": jax.random.normal(ks[1], (C,), jnp.float32) * 0.1,
        "w2": jax.random.normal(ks[2], (C, C, 3, 3), jnp.float32) / np.sqrt(fan_in),
        "b2": jax.random.normal(ks[3], (C,), jnp.float32) * 0.1,
    }

    x = jax.random.normal(ks[4], (N, C, H, W), jnp.float32)
    c1_mem = jax.random.normal(ks[5], (N, C, H, W), jnp.float32) * 0.3
    c2_mem = jax.random.normal(ks[6], (N, C, H, W), jnp.float32) * 0.3
    c1_spike = (jax.random.uniform(ks[7], (N, C, H, W)) > 0.5).astype(jnp.float32)
    c2_spike = (jax.random.uniform(ks[8], (N, C, H, W)) > 0.5).astype(jnp.float32)

    fwd = jax.jit(spiking_basic_block)
    outs = fwd(x, c1_mem, c1_spike, c2_mem, c2_spike, params)
    outs = jax.block_until_ready(outs)

    refs = _ref_forward(x, c1_mem, c1_spike, c2_mem, c2_spike, params)
    for got, want in zip(outs, refs):
        np.testing.assert_allclose(np.asarray(got), np.asarray(want),
                                   rtol=1e-3, atol=1e-3)

    print("KERNEL_OK")
</pallas_src>

<mosaic_0001>
module attributes {stable_mosaic.version = 11 : i64} {
  func.func @_fused_block_kernel(%arg0: i32, %arg1: memref<8x256xf32, #tpu.memory_space<vmem>>, %arg2: memref<8x256xf32, #tpu.memory_space<vmem>>, %arg3: memref<8x256xf32, #tpu.memory_space<vmem>>, %arg4: memref<8x256xf32, #tpu.memory_space<vmem>>, %arg5: memref<8x256xf32, #tpu.memory_space<vmem>>, %arg6: memref<4x36xf32, #tpu.memory_space<vmem>>, %arg7: memref<4x1xf32, #tpu.memory_space<vmem>>, %arg8: memref<4x36xf32, #tpu.memory_space<vmem>>, %arg9: memref<4x1xf32, #tpu.memory_space<vmem>>, %arg10: memref<3x640xf32, #tpu.memory_space<vmem>>, %arg11: memref<8x256xf32, #tpu.memory_space<vmem>>, %arg12: memref<8x256xf32, #tpu.memory_space<vmem>>, %arg13: memref<8x256xf32, #tpu.memory_space<vmem>>, %arg14: memref<8x256xf32, #tpu.memory_space<vmem>>, %arg15: memref<4x704xf32, #tpu.memory_space<vmem>>, %arg16: memref<36x640xf32, #tpu.memory_space<vmem>>) attributes {dimension_semantics = [#tpu.dimension_semantics<parallel>], iteration_bounds = array<i64: 1>, scalar_prefetch = 0 : i64, scratch_operands = 2 : i64, tpu.core_type = #tpu.core_type<tc>, window_params = [{transform_indices = @transform_0, window_bounds = array<i64: 8, 256>}, {transform_indices = @transform_1, window_bounds = array<i64: 8, 256>}, {transform_indices = @transform_2, window_bounds = array<i64: 8, 256>}, {transform_indices = @transform_3, window_bounds = array<i64: 8, 256>}, {transform_indices = @transform_4, window_bounds = array<i64: 8, 256>}, {pipeline_mode = #tpu.pipeline_mode<synchronous>, transform_indices = @transform_5, window_bounds = array<i64: 4, 36>}, {pipeline_mode = #tpu.pipeline_mode<synchronous>, transform_indices = @transform_6, window_bounds = array<i64: 4, 1>}, {pipeline_mode = #tpu.pipeline_mode<synchronous>, transform_indices = @transform_7, window_bounds = array<i64: 4, 36>}, {pipeline_mode = #tpu.pipeline_mode<synchronous>, transform_indices = @transform_8, window_bounds = array<i64: 4, 1>}, {pipeline_mode = #tpu.pipeline_mode<synchronous>, transform_indices = @transform_9, window_bounds = array<i64: 3, 640>}, {transform_indices = @transform_10, window_bounds = array<i64: 8, 256>}, {transform_indices = @transform_11, window_bounds = array<i64: 8, 256>}, {transform_indices = @transform_12, window_bounds = array<i64: 8, 256>}, {transform_indices = @transform_13, window_bounds = array<i64: 8, 256>}]} {
    %c0 = arith.constant 0 : index
    %c0_0 = arith.constant 0 : index
    %0 = vector.load %arg10[%c0, %c0_0] : memref<3x640xf32, #tpu.memory_space<vmem>>, vector<1x640xf32>
    %c1 = arith.constant 1 : index
    %c0_1 = arith.constant 0 : index
    %1 = vector.load %arg10[%c1, %c0_1] : memref<3x640xf32, #tpu.memory_space<vmem>>, vector<1x640xf32>
    %c2 = arith.constant 2 : index
    %c0_2 = arith.constant 0 : index
    %2 = vector.load %arg10[%c2, %c0_2] : memref<3x640xf32, #tpu.memory_space<vmem>>, vector<1x640xf32>
    %cst = arith.constant 0.000000e+00 : f32
    %3 = vector.broadcast %cst : f32 to vector<4x704xf32>
    %c0_3 = arith.constant 0 : index
    %c0_4 = arith.constant 0 : index
    %4 = vector.load %arg15[%c0_3, %c0_4] : memref<4x704xf32, #tpu.memory_space<vmem>>, vector<4x704xf32>
    tpu.vector_store %arg15[%c0_3, %c0_4], %3 {strides = array<i32>} : memref<4x704xf32, #tpu.memory_space<vmem>>, vector<4x704xf32>,
    %c0_5 = arith.constant 0 : index
    %c0_6 = arith.constant 0 : index
    %5 = vector.load %arg1[%c0_5, %c0_6] : memref<8x256xf32, #tpu.memory_space<vmem>>, vector<8x256xf32>
    %6 = vector.extract_strided_slice %5 {offsets = [0, 0], sizes = [4, 256], strides = [1, 1]} : vector<8x256xf32> to vector<4x256xf32>
    %c0_7 = arith.constant 0 : index
    %c64 = arith.constant 64 : index
    %7 = vector.load %arg15[%c0_7, %c64] : memref<4x704xf32, #tpu.memory_space<vmem>>, vector<4x256xf32>
    tpu.vector_store %arg15[%c0_7, %c64], %6 {strides = array<i32>} : memref<4x704xf32, #tpu.memory_space<vmem>>, vector<4x256xf32>,
    %8 = vector.extract_strided_slice %5 {offsets = [4, 0], sizes = [4, 256], strides = [1, 1]} : vector<8x256xf32> to vector<4x256xf32>
    %c0_8 = arith.constant 0 : index
    %c384 = arith.constant 384 : index
    %9 = vector.load %arg15[%c0_8, %c384] : memref<4x704xf32, #tpu.memory_space<vmem>>, vector<4x256xf32>
    tpu.vector_store %arg15[%c0_8, %c384], %8 {strides = array<i32>} : memref<4x704xf32, #tpu.memory_space<vmem>>, vector<4x256xf32>,
    %c0_9 = arith.constant 0 : index
    %c15 = arith.constant 15 : index
    %10 = vector.load %arg15[%c0_9, %c15] : memref<4x704xf32, #tpu.memory_space<vmem>>, vector<4x640xf32>
    %11 = vector.broadcast %0 : vector<1x640xf32> to vector<4x640xf32>
    %12 = arith.mulf %10, %11 : vector<4x640xf32>
    %c0_10 = arith.constant 0 : index
    %c0_11 = arith.constant 0 : index
    %13 = vector.load %arg16[%c0_10, %c0_11] : memref<36x640xf32, #tpu.memory_space<vmem>>, vector<4x640xf32>
    tpu.vector_store %arg16[%c0_10, %c0_11], %12 {strides = array<i32>} : memref<36x640xf32, #tpu.memory_space<vmem>>, vector<4x640xf32>,
    %c0_12 = arith.constant 0 : index
    %c16 = arith.constant 16 : index
    %14 = vector.load %arg15[%c0_12, %c16] : memref<4x704xf32, #tpu.memory_space<vmem>>, vector<4x640xf32>
    %c4 = arith.constant 4 : index
    %c0_13 = arith.constant 0 : index
    %15 = vector.load %arg16[%c4, %c0_13] : memref<36x640xf32, #tpu.memory_space<vmem>>, vector<4x640xf32>
    tpu.vector_store %arg16[%c4, %c0_13], %14 {strides = array<i32>} : memref<36x640xf32, #tpu.memory_space<vmem>>, vector<4x640xf32>,
    %c0_14 = arith.constant 0 : index
    %c17 = arith.constant 17 : index
    %16 = vector.load %arg15[%c0_14, %c17] : memref<4x704xf32, #tpu.memory_space<vmem>>, vector<4x640xf32>
    %17 = vector.broadcast %1 : vector<1x640xf32> to vector<4x640xf32>
    %18 = arith.mulf %16, %17 : vector<4x640xf32>
    %c8 = arith.constant 8 : index
    %c0_15 = arith.constant 0 : index
    %19 = vector.load %arg16[%c8, %c0_15] : memref<36x640xf32, #tpu.memory_space<vmem>>, vector<4x640xf32>
    tpu.vector_store %arg16[%c8, %c0_15], %18 {strides = array<i32>} : memref<36x640xf32, #tpu.memory_space<vmem>>, vector<4x640xf32>,
    %c0_16 = arith.constant 0 : index
    %c31 = arith.constant 31 : index
    %20 = vector.load %arg15[%c0_16, %c31] : memref<4x704xf32, #tpu.memory_space<vmem>>, vector<4x640xf32>
    %21 = vector.broadcast %0 : vector<1x640xf32> to vector<4x640xf32>
    %22 = arith.mulf %20, %21 : vector<4x640xf32>
    %c12 = arith.constant 12 : index
    %c0_17 = arith.constant 0 : index
    %23 = vector.load %arg16[%c12, %c0_17] : memref<36x640xf32, #tpu.memory_space<vmem>>, vector<4x640xf32>
    tpu.vector_store %arg16[%c12, %c0_17], %22 {strides = array<i32>} : memref<36x640xf32, #tpu.memory_space<vmem>>, vector<4x640xf32>,
    %c0_18 = arith.constant 0 : index
    %c32 = arith.constant 32 : index
    %24 = vector.load %arg15[%c0_18, %c32] : memref<4x704xf32, #tpu.memory_space<vmem>>, vector<4x640xf32>
    %c16_19 = arith.constant 16 : index
    %c0_20 = arith.constant 0 : index
    %25 = vector.load %arg16[%c16_19, %c0_20] : memref<36x640xf32, #tpu.memory_space<vmem>>, vector<4x640xf32>
    tpu.vector_store %arg16[%c16_19, %c0_20], %24 {strides = array<i32>} : memref<36x640xf32, #tpu.memory_space<vmem>>, vector<4x640xf32>,
    %c0_21 = arith.constant 0 : index
    %c33 = arith.constant 33 : index
    %26 = vector.load %arg15[%c0_21, %c33] : memref<4x704xf32, #tpu.memory_space<vmem>>, vector<4x640xf32>
    %27 = vector.broadcast %1 : vector<1x640xf32> to vector<4x640xf32>
    %28 = arith.mulf %26, %27 : vector<4x640xf32>
    %c20 = arith.constant 20 : index
    %c0_22 = arith.constant 0 : index
    %29 = vector.load %arg16[%c20, %c0_22] : memref<36x640xf32, #tpu.memory_space<vmem>>, vector<4x640xf32>
    tpu.vector_store %arg16[%c20, %c0_22], %28 {strides = array<i32>} : memref<36x640xf32, #tpu.memory_space<vmem>>, vector<4x640xf32>,
    %c0_23 = arith.constant 0 : index
    %c47 = arith.constant 47 : index
    %30 = vector.load %arg15[%c0_23, %c47] : memref<4x704xf32, #tpu.memory_space<vmem>>, vector<4x640xf32>
    %31 = vector.broadcast %0 : vector<1x640xf32> to vector<4x640xf32>
    %32 = arith.mulf %30, %31 : vector<4x640xf32>
    %c24 = arith.constant 24 : index
    %c0_24 = arith.constant 0 : index
    %33 = vector.load %arg16[%c24, %c0_24] : memref<36x640xf32, #tpu.memory_space<vmem>>, vector<4x640xf32>
    tpu.vector_store %arg16[%c24, %c0_24], %32 {strides = array<i32>} : memref<36x640xf32, #tpu.memory_space<vmem>>, vector<4x640xf32>,
    %c0_25 = arith.constant 0 : index
    %c48 = arith.constant 48 : index
    %34 = vector.load %arg15[%c0_25, %c48] : memref<4x704xf32, #tpu.memory_space<vmem>>, vector<4x640xf32>
    %c28 = arith.constant 28 : index
    %c0_26 = arith.constant 0 : index
    %35 = vector.load %arg16[%c28, %c0_26] : memref<36x640xf32, #tpu.memory_space<vmem>>, vector<4x640xf32>
    tpu.vector_store %arg16[%c28, %c0_26], %34 {strides = array<i32>} : memref<36x640xf32, #tpu.memory_space<vmem>>, vector<4x640xf32>,
    %c0_27 = arith.constant 0 : index
    %c49 = arith.constant 49 : index
    %36 = vector.load %arg15[%c0_27, %c49] : memref<4x704xf32, #tpu.memory_space<vmem>>, vector<4x640xf32>
    %37 = vector.broadcast %1 : vector<1x640xf32> to vector<4x640xf32>
    %38 = arith.mulf %36, %37 : vector<4x640xf32>
    %c32_28 = arith.constant 32 : index
    %c0_29 = arith.constant 0 : index
    %39 = vector.load %arg16[%c32_28, %c0_29] : memref<36x640xf32, #tpu.memory_space<vmem>>, vector<4x640xf32>
    tpu.vector_store %arg16[%c32_28, %c0_29], %38 {strides = array<i32>} : memref<36x640xf32, #tpu.memory_space<vmem>>, vector<4x640xf32>,
    %c0_30 = arith.constant 0 : index
    %c0_31 = arith.constant 0 : index
    %40 = vector.load %arg6[%c0_30, %c0_31] : memref<4x36xf32, #tpu.memory_space<vmem>>, vector<4x36xf32>
    %c0_32 = arith.constant 0 : index
    %c0_33 = arith.constant 0 : index
    %41 = vector.load %arg16[%c0_32, %c0_33] : memref<36x640xf32, #tpu.memory_space<vmem>>, vector<36x640xf32>
    %cst_34 = arith.constant dense<0.000000e+00> : vector<4x640xf32>
    %42 = tpu.matmul %40, %41, %cst_34 {dimension_numbers = #tpu.dot_dimension_numbers<[1], [0], [0], [1], [0, 0, 1, 1], [], []>} : vector<4x36xf32>, vector<36x640xf32>, vector<4x640xf32> -> vector<4x640xf32>
    %c0_35 = arith.constant 0 : index
    %c0_36 = arith.constant 0 : index
    %43 = vector.load %arg7[%c0_35, %c0_36] : memref<4x1xf32, #tpu.memory_space<vmem>>, vector<4x1xf32>
    %44 = vector.broadcast %43 : vector<4x1xf32> to vector<4x640xf32>
    %45 = arith.addf %42, %44 : vector<4x640xf32>
    %46 = vector.broadcast %2 : vector<1x640xf32> to vector<4x640xf32>
    %47 = arith.mulf %45, %46 : vector<4x640xf32>
    %48 = vector.extract_strided_slice %47 {offsets = [0, 32], sizes = [4, 256], strides = [1, 1]} : vector<4x640xf32> to vector<4x256xf32>
    %49 = vector.extract_strided_slice %47 {offsets = [0, 352], sizes = [4, 256], strides = [1, 1]} : vector<4x640xf32> to vector<4x256xf32>
    %50 = tpu.concatenate %48, %49 in 0 : vector<4x256xf32>, vector<4x256xf32> -> vector<8x256xf32>
    %c0_37 = arith.constant 0 : index
    %c0_38 = arith.constant 0 : index
    %51 = vector.load %arg2[%c0_37, %c0_38] : memref<8x256xf32, #tpu.memory_space<vmem>>, vector<8x256xf32>
    %cst_39 = arith.constant 8.000000e-01 : f32
    %52 = vector.broadcast %cst_39 : f32 to vector<8x256xf32>
    %53 = arith.mulf %51, %52 : vector<8x256xf32>
    %c0_40 = arith.constant 0 : index
    %c0_41 = arith.constant 0 : index
    %54 = vector.load %arg3[%c0_40, %c0_41] : memref<8x256xf32, #tpu.memory_space<vmem>>, vector<8x256xf32>
    %cst_42 = arith.constant 1.000000e+00 : f32
    %55 = vector.broadcast %cst_42 : f32 to vector<8x256xf32>
    %56 = arith.subf %55, %54 : vector<8x256xf32>
    %57 = arith.mulf %53, %56 : vector<8x256xf32>
    %58 = arith.addf %57, %50 : vector<8x256xf32>
    %cst_43 = arith.constant 5.000000e-01 : f32
    %59 = vector.broadcast %cst_43 : f32 to vector<8x256xf32>
    %60 = arith.cmpf ogt, %58, %59 : vector<8x256xf32>
    %61 = arith.extui %60 : vector<8x256xi1> to vector<8x256xi32>
    %62 = arith.sitofp %61 : vector<8x256xi32> to vector<8x256xf32>
    %c0_44 = arith.constant 0 : index
    %c0_45 = arith.constant 0 : index
    %63 = vector.load %arg11[%c0_44, %c0_45] : memref<8x256xf32, #tpu.memory_space<vmem>>, vector<8x256xf32>
    tpu.vector_store %arg11[%c0_44, %c0_45], %58 {strides = array<i32>} : memref<8x256xf32, #tpu.memory_space<vmem>>, vector<8x256xf32>,
    %c0_46 = arith.constant 0 : index
    %c0_47 = arith.constant 0 : index
    %64 = vector.load %arg12[%c0_46, %c0_47] : memref<8x256xf32, #tpu.memory_space<vmem>>, vector<8x256xf32>
    tpu.vector_store %arg12[%c0_46, %c0_47], %62 {strides = array<i32>} : memref<8x256xf32, #tpu.memory_space<vmem>>, vector<8x256xf32>,
    %c0_48 = arith.constant 0 : index
    %c32_49 = arith.constant 32 : index
    %65 = vector.load %arg15[%c0_48, %c32_49] : memref<4x704xf32, #tpu.memory_space<vmem>>, vector<4x640xf32>
    tpu.vector_store %arg15[%c0_48, %c32_49], %47 {strides = array<i32>} : memref<4x704xf32, #tpu.memory_space<vmem>>, vector<4x640xf32>,
    %c0_50 = arith.constant 0 : index
    %c15_51 = arith.constant 15 : index
    %66 = vector.load %arg15[%c0_50, %c15_51] : memref<4x704xf32, #tpu.memory_space<vmem>>, vector<4x640xf32>
    %67 = vector.broadcast %0 : vector<1x640xf32> to vector<4x640xf32>
    %68 = arith.mulf %66, %67 : vector<4x640xf32>
    %c0_52 = arith.constant 0 : index
    %c0_53 = arith.constant 0 : index
    %69 = vector.load %arg16[%c0_52, %c0_53] : memref<36x640xf32, #tpu.memory_space<vmem>>, vector<4x640xf32>
    tpu.vector_store %arg16[%c0_52, %c0_53], %68 {strides = array<i32>} : memref<36x640xf32, #tpu.memory_space<vmem>>, vector<4x640xf32>,
    %c0_54 = arith.constant 0 : index
    %c16_55 = arith.constant 16 : index
    %70 = vector.load %arg15[%c0_54, %c16_55] : memref<4x704xf32, #tpu.memory_space<vmem>>, vector<4x640xf32>
    %c4_56 = arith.constant 4 : index
    %c0_57 = arith.constant 0 : index
    %71 = vector.load %arg16[%c4_56, %c0_57] : memref<36x640xf32, #tpu.memory_space<vmem>>, vector<4x640xf32>
    tpu.vector_store %arg16[%c4_56, %c0_57], %70 {strides = array<i32>} : memref<36x640xf32, #tpu.memory_space<vmem>>, vector<4x640xf32>,
    %c0_58 = arith.constant 0 : index
    %c17_59 = arith.constant 17 : index
    %72 = vector.load %arg15[%c0_58, %c17_59] : memref<4x704xf32, #tpu.memory_space<vmem>>, vector<4x640xf32>
    %73 = vector.broadcast %1 : vector<1x640xf32> to vector<4x640xf32>
    %74 = arith.mulf %72, %73 : vector<4x640xf32>
    %c8_60 = arith.constant 8 : index
    %c0_61 = arith.constant 0 : index
    %75 = vector.load %arg16[%c8_60, %c0_61] : memref<36x640xf32, #tpu.memory_space<vmem>>, vector<4x640xf32>
    tpu.vector_store %arg16[%c8_60, %c0_61], %74 {strides = array<i32>} : memref<36x640xf32, #tpu.memory_space<vmem>>, vector<4x640xf32>,
    %c0_62 = arith.constant 0 : index
    %c31_63 = arith.constant 31 : index
    %76 = vector.load %arg15[%c0_62, %c31_63] : memref<4x704xf32, #tpu.memory_space<vmem>>, vector<4x640xf32>
    %77 = vector.broadcast %0 : vector<1x640xf32> to vector<4x640xf32>
    %78 = arith.mulf %76, %77 : vector<4x640xf32>
    %c12_64 = arith.constant 12 : index
    %c0_65 = arith.constant 0 : index
    %79 = vector.load %arg16[%c12_64, %c0_65] : memref<36x640xf32, #tpu.memory_space<vmem>>, vector<4x640xf32>
    tpu.vector_store %arg16[%c12_64, %c0_65], %78 {strides = array<i32>} : memref<36x640xf32, #tpu.memory_space<vmem>>, vector<4x640xf32>,
    %c0_66 = arith.constant 0 : index
    %c32_67 = arith.constant 32 : index
    %80 = vector.load %arg15[%c0_66, %c32_67] : memref<4x704xf32, #tpu.memory_space<vmem>>, vector<4x640xf32>
    %c16_68 = arith.constant 16 : index
    %c0_69 = arith.constant 0 : index
    %81 = vector.load %arg16[%c16_68, %c0_69] : memref<36x640xf32, #tpu.memory_space<vmem>>, vector<4x640xf32>
    tpu.vector_store %arg16[%c16_68, %c0_69], %80 {strides = array<i32>} : memref<36x640xf32, #tpu.memory_space<vmem>>, vector<4x640xf32>,
    %c0_70 = arith.constant 0 : index
    %c33_71 = arith.constant 33 : index
    %82 = vector.load %arg15[%c0_70, %c33_71] : memref<4x704xf32, #tpu.memory_space<vmem>>, vector<4x640xf32>
    %83 = vector.broadcast %1 : vector<1x640xf32> to vector<4x640xf32>
    %84 = arith.mulf %82, %83 : vector<4x640xf32>
    %c20_72 = arith.constant 20 : index
    %c0_73 = arith.constant 0 : index
    %85 = vector.load %arg16[%c20_72, %c0_73] : memref<36x640xf32, #tpu.memory_space<vmem>>, vector<4x640xf32>
    tpu.vector_store %arg16[%c20_72, %c0_73], %84 {strides = array<i32>} : memref<36x640xf32, #tpu.memory_space<vmem>>, vector<4x640xf32>,
    %c0_74 = arith.constant 0 : index
    %c47_75 = arith.constant 47 : index
    %86 = vector.load %arg15[%c0_74, %c47_75] : memref<4x704xf32, #tpu.memory_space<vmem>>, vector<4x640xf32>
    %87 = vector.broadcast %0 : vector<1x640xf32> to vector<4x640xf32>
    %88 = arith.mulf %86, %87 : vector<4x640xf32>
    %c24_76 = arith.constant 24 : index
    %c0_77 = arith.constant 0 : index
    %89 = vector.load %arg16[%c24_76, %c0_77] : memref<36x640xf32, #tpu.memory_space<vmem>>, vector<4x640xf32>
    tpu.vector_store %arg16[%c24_76, %c0_77], %88 {strides = array<i32>} : memref<36x640xf32, #tpu.memory_space<vmem>>, vector<4x640xf32>,
    %c0_78 = arith.constant 0 : index
    %c48_79 = arith.constant 48 : index
    %90 = vector.load %arg15[%c0_78, %c48_79] : memref<4x704xf32, #tpu.memory_space<vmem>>, vector<4x640xf32>
    %c28_80 = arith.constant 28 : index
    %c0_81 = arith.constant 0 : index
    %91 = vector.load %arg16[%c28_80, %c0_81] : memref<36x640xf32, #tpu.memory_space<vmem>>, vector<4x640xf32>
    tpu.vector_store %arg16[%c28_80, %c0_81], %90 {strides = array<i32>} : memref<36x640xf32, #tpu.memory_space<vmem>>, vector<4x640xf32>,
    %c0_82 = arith.constant 0 : index
    %c49_83 = arith.constant 49 : index
    %92 = vector.load %arg15[%c0_82, %c49_83] : memref<4x704xf32, #tpu.memory_space<vmem>>, vector<4x640xf32>
    %93 = vector.broadcast %1 : vector<1x640xf32> to vector<4x640xf32>
    %94 = arith.mulf %92, %93 : vector<4x640xf32>
    %c32_84 = arith.constant 32 : index
    %c0_85 = arith.constant 0 : index
    %95 = vector.load %arg16[%c32_84, %c0_85] : memref<36x640xf32, #tpu.memory_space<vmem>>, vector<4x640xf32>
    tpu.vector_store %arg16[%c32_84, %c0_85], %94 {strides = array<i32>} : memref<36x640xf32, #tpu.memory_space<vmem>>, vector<4x640xf32>,
    %c0_86 = arith.constant 0 : index
    %c0_87 = arith.constant 0 : index
    %96 = vector.load %arg8[%c0_86, %c0_87] : memref<4x36xf32, #tpu.memory_space<vmem>>, vector<4x36xf32>
    %c0_88 = arith.constant 0 : index
    %c0_89 = arith.constant 0 : index
    %97 = vector.load %arg16[%c0_88, %c0_89] : memref<36x640xf32, #tpu.memory_space<vmem>>, vector<36x640xf32>
    %cst_90 = arith.constant dense<0.000000e+00> : vector<4x640xf32>
    %98 = tpu.matmul %96, %97, %cst_90 {dimension_numbers = #tpu.dot_dimension_numbers<[1], [0], [0], [1], [0, 0, 1, 1], [], []>} : vector<4x36xf32>, vector<36x640xf32>, vector<4x640xf32> -> vector<4x640xf32>
    %c0_91 = arith.constant 0 : index
    %c0_92 = arith.constant 0 : index
    %99 = vector.load %arg9[%c0_91, %c0_92] : memref<4x1xf32, #tpu.memory_space<vmem>>, vector<4x1xf32>
    %100 = vector.broadcast %99 : vector<4x1xf32> to vector<4x640xf32>
    %101 = arith.addf %98, %100 : vector<4x640xf32>
    %102 = vector.extract_strided_slice %101 {offsets = [0, 32], sizes = [4, 256], strides = [1, 1]} : vector<4x640xf32> to vector<4x256xf32>
    %103 = vector.extract_strided_slice %101 {offsets = [0, 352], sizes = [4, 256], strides = [1, 1]} : vector<4x640xf32> to vector<4x256xf32>
    %104 = tpu.concatenate %102, %103 in 0 : vector<4x256xf32>, vector<4x256xf32> -> vector<8x256xf32>
    %105 = arith.addf %104, %5 : vector<8x256xf32>
    %c0_93 = arith.constant 0 : index
    %c0_94 = arith.constant 0 : index
    %106 = vector.load %arg4[%c0_93, %c0_94] : memref<8x256xf32, #tpu.memory_space<vmem>>, vector<8x256xf32>
    %cst_95 = arith.constant 8.000000e-01 : f32
    %107 = vector.broadcast %cst_95 : f32 to vector<8x256xf32>
    %108 = arith.mulf %106, %107 : vector<8x256xf32>
    %c0_96 = arith.constant 0 : index
    %c0_97 = arith.constant 0 : index
    %109 = vector.load %arg5[%c0_96, %c0_97] : memref<8x256xf32, #tpu.memory_space<vmem>>, vector<8x256xf32>
    %cst_98 = arith.constant 1.000000e+00 : f32
    %110 = vector.broadcast %cst_98 : f32 to vector<8x256xf32>
    %111 = arith.subf %110, %109 : vector<8x256xf32>
    %112 = arith.mulf %108, %111 : vector<8x256xf32>
    %113 = arith.addf %112, %105 : vector<8x256xf32>
    %cst_99 = arith.constant 5.000000e-01 : f32
    %114 = vector.broadcast %cst_99 : f32 to vector<8x256xf32>
    %115 = arith.cmpf ogt, %113, %114 : vector<8x256xf32>
    %116 = arith.extui %115 : vector<8x256xi1> to vector<8x256xi32>
    %117 = arith.sitofp %116 : vector<8x256xi32> to vector<8x256xf32>
    %c0_100 = arith.constant 0 : index
    %c0_101 = arith.constant 0 : index
    %118 = vector.load %arg13[%c0_100, %c0_101] : memref<8x256xf32, #tpu.memory_space<vmem>>, vector<8x256xf32>
    tpu.vector_store %arg13[%c0_100, %c0_101], %113 {strides = array<i32>} : memref<8x256xf32, #tpu.memory_space<vmem>>, vector<8x256xf32>,
    %c0_102 = arith.constant 0 : index
    %c0_103 = arith.constant 0 : index
    %119 = vector.load %arg14[%c0_102, %c0_103] : memref<8x256xf32, #tpu.memory_space<vmem>>, vector<8x256xf32>
    tpu.vector_store %arg14[%c0_102, %c0_103], %117 {strides = array<i32>} : memref<8x256xf32, #tpu.memory_space<vmem>>, vector<8x256xf32>,
    return
  }
  func.func @transform_0(%arg0: i32) -> (i32, i32) {
    %c0_i32 = arith.constant 0 : i32
    %c0_i32_0 = arith.constant 0 : i32
    return %arg0, %c0_i32 : i32, i32
  }
  func.func @transform_1(%arg0: i32) -> (i32, i32) {
    %c0_i32 = arith.constant 0 : i32
    %c0_i32_0 = arith.constant 0 : i32
    return %arg0, %c0_i32 : i32, i32
  }
  func.func @transform_2(%arg0: i32) -> (i32, i32) {
    %c0_i32 = arith.constant 0 : i32
    %c0_i32_0 = arith.constant 0 : i32
    return %arg0, %c0_i32 : i32, i32
  }
  func.func @transform_3(%arg0: i32) -> (i32, i32) {
    %c0_i32 = arith.constant 0 : i32
    %c0_i32_0 = arith.constant 0 : i32
    return %arg0, %c0_i32 : i32, i32
  }
  func.func @transform_4(%arg0: i32) -> (i32, i32) {
    %c0_i32 = arith.constant 0 : i32
    %c0_i32_0 = arith.constant 0 : i32
    return %arg0, %c0_i32 : i32, i32
  }
  func.func @transform_5(%arg0: i32) -> (i32, i32) {
    %c0_i32 = arith.constant 0 : i32
    %c0_i32_0 = arith.constant 0 : i32
    %c0_i32_1 = arith.constant 0 : i32
    return %c0_i32, %c0_i32_0 : i32, i32
  }
  func.func @transform_6(%arg0: i32) -> (i32, i32) {
    %c0_i32 = arith.constant 0 : i32
    %c0_i32_0 = arith.constant 0 : i32
    %c0_i32_1 = arith.constant 0 : i32
    return %c0_i32, %c0_i32_0 : i32, i32
  }
  func.func @transform_7(%arg0: i32) -> (i32, i32) {
    %c0_i32 = arith.constant 0 : i32
    %c0_i32_0 = arith.constant 0 : i32
    %c0_i32_1 = arith.constant 0 : i32
    return %c0_i32, %c0_i32_0 : i32, i32
  }
  func.func @transform_8(%arg0: i32) -> (i32, i32) {
    %c0_i32 = arith.constant 0 : i32
    %c0_i32_0 = arith.constant 0 : i32
    %c0_i32_1 = arith.constant 0 : i32
    return %c0_i32, %c0_i32_0 : i32, i32
  }
  func.func @transform_9(%arg0: i32) -> (i32, i32) {
    %c0_i32 = arith.constant 0 : i32
    %c0_i32_0 = arith.constant 0 : i32
    %c0_i32_1 = arith.constant 0 : i32
    return %c0_i32, %c0_i32_0 : i32, i32
  }
  func.func @transform_10(%arg0: i32) -> (i32, i32) {
    %c0_i32 = arith.constant 0 : i32
    %c0_i32_0 = arith.constant 0 : i32
    return %arg0, %c0_i32 : i32, i32
  }
  func.func @transform_11(%arg0: i32) -> (i32, i32) {
    %c0_i32 = arith.constant 0 : i32
    %c0_i32_0 = arith.constant 0 : i32
    return %arg0, %c0_i32 : i32, i32
  }
  func.func @transform_12(%arg0: i32) -> (i32, i32) {
    %c0_i32 = arith.constant 0 : i32
    %c0_i32_0 = arith.constant 0 : i32
    return %arg0, %c0_i32 : i32, i32
  }
  func.func @transform_13(%arg0: i32) -> (i32, i32) {
    %c0_i32 = arith.constant 0 : i32
    %c0_i32_0 = arith.constant 0 : i32
    return %arg0, %c0_i32 : i32, i32
  }
}

</mosaic_0001>

<bundles_post_ra>
// kernel: spiking_basic_block.1
= control target key start
LH: loop header
LB: loop body
LE: loop exit
PB: predicated region body
PF: predicated region fallthrough
CT: control target
= control target key end

     0   :  { %v75_v0 = vlaneseq  ;;  %vm46_vm0 = vcmask 1043456   ;;  %vm47_vm1 = vcmask 523268   ;;  %v1736_v3 = vmov 0.0   ;;  %s1737_s16 = smov 64   ;;  %s1738_s17 = smov 49   ;;  %s2591_s0 = inlined_call_operand.vmem [shape: f32[8,256], index: 0, kind: input, shape index: {}]   ;;  %s2592_s9 = inlined_call_operand.vmem [shape: f32[3,640], index: 9, kind: input, shape index: {}]   ;;  %s2593_s6 = inlined_call_operand.vmem [shape: f32[4,1], index: 6, kind: input, shape index: {}]   ;;  %s2594_s5 = inlined_call_operand.vmem [shape: f32[4,36], index: 5, kind: input, shape index: {}]   ;;  %s2595_s8 = inlined_call_operand.vmem [shape: f32[4,1], index: 8, kind: input, shape index: {}]   ;;  %s2596_s7 = inlined_call_operand.vmem [shape: f32[4,36], index: 7, kind: input, shape index: {}]   ;;  %s2597_s1 = inlined_call_operand.vmem [shape: f32[8,256], index: 1, kind: input, shape index: {}, may-alias: {1,10}]   ;;  %s2598_s2 = inlined_call_operand.vmem [shape: f32[8,256], index: 2, kind: input, shape index: {}, may-alias: {2,11}]   ;;  %s2599_s3 = inlined_call_operand.vmem [shape: f32[8,256], index: 3, kind: input, shape index: {}, may-alias: {3,12}]   ;;  %s2600_s4 = inlined_call_operand.vmem [shape: f32[8,256], index: 4, kind: input, shape index: {}, may-alias: {4,13}]   ;;  %s2601_s10 = inlined_call_operand.vmem [shape: f32[8,256], index: 10, kind: output, shape index: {0}, may-alias: {1,10}]   ;;  %s2602_s11 = inlined_call_operand.vmem [shape: f32[8,256], index: 11, kind: output, shape index: {1}, may-alias: {2,11}]   ;;  %s2603_s12 = inlined_call_operand.vmem [shape: f32[8,256], index: 12, kind: output, shape index: {2}, may-alias: {3,12}]   ;;  %s2604_s13 = inlined_call_operand.vmem [shape: f32[8,256], index: 13, kind: output, shape index: {3}, may-alias: {4,13}]  }
   0x1   :  { %v50_v1 = vld [vmem:[%s2591_s0] sm:$0xff]  ;;  %v51_v2 = vld [vmem:[%s2591_s0 + $0x8] sm:$0xff]  ;;  %44 = vst [vmem:[#allocation2] sm:$0xff] %v1736_v3  ;;  %45 = vst [vmem:[#allocation2 + $0x8] sm:$0xff] %v1736_v3  ;;  %762 = vmatprep.mubr.f32.mxu1 %v1736_v3  ;;  %691 = vmatprep.mubr.f32.mxu0 %v1736_v3  ;;  %s1739_s18 = smov 47   ;;  %s1740_s19 = smov 33  }
   0x2   :  { %v54_v4 = vcombine.low %v50_v1, %v51_v2  ;;  %v68_v5 = vcombine.high %v50_v1, %v51_v2  ;;  %v76_v6 = vshrl.u32 %v75_v0, 7  ;;  %vm48_vm2 = vmor %vm47_vm1, %vm46_vm0  ;;  %v1640_v7 = vld [vmem:[%s2592_s9 + $0x1] ss:$4 sm:$0x1f]  ;;  %s1741_s20 = smov 31   ;;  %s1742_s21 = smov 17  }
   0x3   :  { %v39_v8 = vld [vmem:[%s2592_s9] ss:$4 sm:$0x1f]  ;;  %49 = vst.msk [vmem:[#allocation2 + $0x10] sm:$0xff] %vm48_vm2, %v1736_v3  ;;  %s1743_s22 = smov 15   ;;  %s1744_s23 = smov 80  }
   0x4   :  { %55 = vrot.lane.b32.xlu0 %v54_v4, %s1737_s16  ;;  %v1845_v9 = vsub.s32 4, %v76_v6  ;;  %v1847_v10 = vsub.s32 0, %v76_v6  ;;  %v1849_v11 = vsub.s32 1, %v76_v6  ;;  %v1851_v12 = vsub.s32 2, %v76_v6  ;;  %70 = vst [vmem:[#allocation2 + $0xc] sm:$0xff] %v68_v5  ;;  %s1745_s24 = smov 96  }
   0x5   :  { %v1853_v13 = vsub.s32 3, %v76_v6  ;;  %s1746_s25 = smov 112   ;;  %vm62_vm3 = vcmask 1043968   ;;  %vm63_vm4 = vcmask 1047556   ;;  %vm2605_vm5 = vcmask 523264   ;;  %s1747_s26 = smov 79  }
   0x6   :  { %v212_v14 = vrot.slane %v1640_v7, %v1845_v9  ;;  %v196_v15 = vrot.slane %v1640_v7, %v1847_v10  ;;  %v200_v16 = vrot.slane %v1640_v7, %v1849_v11  ;;  %v204_v17 = vrot.slane %v1640_v7, %v1851_v12  ;;  %vm64_vm7 = vmor %vm63_vm4, %vm62_vm3  ;;  %s1748_s27 = smov 81   ;;  %s1749_s28 = smov 111  }
   0x7   :  { %v208_v18 = vrot.slane %v1640_v7, %v1853_v13  ;;  %v86_v19 = vrot.slane %v39_v8, %v1851_v12  ;;  %v90_v20 = vrot.slane %v39_v8, %v1853_v13  ;;  %v78_v22 = vrot.slane %v39_v8, %v1847_v10  ;;  %s1750_s29 = smov 95   ;;  %s1751_s30 = smov 113  }
   0x8   :  { %525 = vrot.lane.b32.xlu1 %v212_v14, %s1738_s17  ;;  %v213_v21 = vcombine.low %v196_v15, %v200_v16  ;;  %v82_v23 = vrot.slane %v39_v8, %v1849_v11  ;;  %v94_v27 = vrot.slane %v39_v8, %v1845_v9  ;;  %vm66_vm6 = vcmask 519168   ;;  %s1752_s14 = smov 97  }
   0x9   :  { %v214_v24 = vcombine.low %v204_v17, %v208_v18  ;;  %v96_v25 = vcombine.low %v86_v19, %v90_v20  ;;  %vm530_vm8 = vcmask 400384   ;;  %vm435_vm9 = vcmask 384000  }
   0xa   :  { %521 = vrot.lane.b32.xlu0 %v213_v21, %s1738_s17  ;;  %v95_v26 = vcombine.low %v78_v22, %v82_v23  ;;  %vm224_vm10 = vcmask 138240   ;;  %vm377_vm11 = vcmask 269312   ;;  %vm106_vm12 = vcmask 121856  }
   0xb   :  { %v1865_v28 = vld [vmem:[#allocation2 + $0x10] sm:$0xff]  ;;  %vm282_vm13 = vcmask 252928   ;;  %vm502_vm14 = vcmask 654336   ;;  %vm173_vm15 = vcmask 916480   ;;  %vm349_vm1 = vcmask 785408  }
   0xc   :  { %523 = vrot.lane.b32.xlu1 %v214_v24, %s1738_s17  ;;  %v489_v29 = vcombine.low %v1865_v28, %v1865_v28  ;;  %vm465_vm2 = vcmask 662528   ;;  %vm407_vm3 = vcmask 777216  }
   0xe   :  { %428 = vrot.lane.b32.xlu0 %v96_v25, %s1739_s18 }
  0x10   :  { %426 = vrot.lane.b32.xlu1 %v95_v26, %s1739_s18 }
  0x12   :  { %368 = vrot.lane.b32.xlu0 %v213_v21, %s1740_s19 }
  0x14   :  { %370 = vrot.lane.b32.xlu1 %v214_v24, %s1740_s19 }
  0x16   :  { %372 = vrot.lane.b32.xlu0 %v212_v14, %s1740_s19 }
  0x18   :  { %430 = vrot.lane.b32.xlu1 %v94_v27, %s1739_s18 }
  0x1a   :  { %273 = vrot.lane.b32.xlu0 %v95_v26, %s1741_s20 }
  0x1c   :  { %275 = vrot.lane.b32.xlu1 %v96_v25, %s1741_s20 }
  0x1e   :  { %215 = vrot.lane.b32.xlu0 %v213_v21, %s1742_s21 }
  0x20   :  { %217 = vrot.lane.b32.xlu1 %v214_v24, %s1742_s21 }
  0x22   :  { %277 = vrot.lane.b32.xlu0 %v94_v27, %s1741_s20  ;;  %s1755_s20 = smov 32  }
  0x24   :  { %97 = vrot.lane.b32.xlu1 %v95_v26, %s1743_s22 }
  0x26   :  { %99 = vrot.lane.b32.xlu0 %v96_v25, %s1743_s22 }
  0x28   :  { %219 = vrot.lane.b32.xlu1 %v212_v14, %s1742_s21 }
  0x2a   :  { %101 = vrot.lane.b32.xlu0 %v94_v27, %s1743_s22 }
  0x2c   :  { %498 = vrot.lane.b32.xlu1 %v489_v29, %s1744_s23 }
  0x2e   :  { %345 = vrot.lane.b32.xlu0 %v1865_v28, %s1745_s24 }
  0x30   :  { %169 = vrot.lane.b32.xlu1 %v489_v29, %s1746_s25 }
  0x76   :  { %v56_v30 = vpop.permute.xlu0 %55 }
  0x77   :  { %v57_v31 = vrot.slane %v56_v30, 4 }
  0x79   :  { %v59_v32 = vsel %vm2605_vm5, %v57_v31, %v56_v30  ;;  %67 = vst.msk [vmem:[#allocation2 + $0x8] sm:$0xf] %vm66_vm6, %v57_v31  ;;  %vm312_vm6 = vcmask 793600  }
  0x7a   :  { %65 = vst.msk [vmem:[#allocation2] sm:$0xff] %vm64_vm7, %v59_v32  ;;  %v526_v33 = vpop.permute.xlu1 %525  ;;  %vm254_vm7 = vcmask 908288  }
  0x7b   :  { %v529_v36 = vrot.slane %v526_v33, 4 }
  0x7c   :  { %v1875_v34 = vpop.permute.xlu0 %521 }
  0x7d   :  { %v527_v54 = vrot.slane %v1875_v34, 4 }
  0x7e   :  { %v524_v35 = vpop.permute.xlu1 %523 }
  0x7f   :  { %v528_v37 = vrot.slane %v524_v35, 4 }
  0x80   :  { %v429_v38 = vpop.permute.xlu0 %428  ;;  %v1877_v39 = vld [vmem:[#allocation2 + $0x8] sm:$0xff] }
  0x81   :  { %496 = vrot.lane.b32.xlu0 %v1877_v39, %s1744_s23  ;;  %341 = vrot.lane.b32.xlu1 %v1877_v39, %s1745_s24  ;;  %v534_v40 = vsel %vm46_vm0, %v528_v37, %v529_v36  ;;  %v433_v43 = vrot.slane %v429_v38, 4  ;;  %v1914_v52 = vld [vmem:[#allocation2] sm:$0xff]  ;;  %v488_v55 = vcombine.low %v1877_v39, %v1877_v39  ;;  %v532_v57 = vsel %vm46_vm0, %v527_v54, %v528_v37 }
  0x82   :  { %v1884_v41 = vpop.permute.xlu1 %426  ;;  %v1887_v42 = vsel %vm530_vm8, %v534_v40, %v526_v33  ;;  %v335_v60 = vcombine.high %v1877_v39, %v1877_v39  ;;  %v1936_v61 = vsel %vm530_vm8, %v532_v57, %v524_v35  ;;  %v2030_v57 = vsel %vm530_vm8, %v527_v54, %v1875_v34 }
  0x83   :  { %v432_v44 = vrot.slane %v1884_v41, 4  ;;  %v1892_v45 = vmul.f32 %v1887_v42, %v1865_v28  ;;  %v1949_v6 = vmul.f32 %v1936_v61, %v1877_v39  ;;  %v487_v54 = vcombine.low %v1914_v52, %v1914_v52 }
  0x84   :  { %v1894_v46 = vpop.permute.xlu0 %368  ;;  %vm560_vm8 = vcmask 646144  }
  0x85   :  { %556 = vrot.lane.b32.xlu1 %v1892_v45, %s1747_s26  ;;  %167 = vrot.lane.b32.xlu0 %v1877_v39, %s1746_s25  ;;  %v437_v47 = vsel %vm46_vm0, %v432_v44, %v433_v43  ;;  %v374_v2 = vrot.slane %v1894_v46, 4  ;;  %v2047_v34 = vsel %vm435_vm9, %v432_v44, %v1884_v41  ;;  %v334_v44 = vcombine.high %v1914_v52, %v1914_v52 }
  0x86   :  { %v1903_v48 = vpop.permute.xlu1 %370  ;;  %v1906_v49 = vsel %vm435_vm9, %v437_v47, %v429_v38 }
  0x87   :  { %v1910_v50 = vmul.f32 %v1877_v39, %v1906_v49  ;;  %v375_v63 = vrot.slane %v1903_v48, 4 }
  0x88   :  { %v1912_v51 = vpop.permute.xlu0 %372 }
  0x89   :  { %492 = vrot.lane.b32.xlu0 %v1914_v52, %s1744_s23  ;;  %457 = vrot.lane.b32.xlu1 %v1910_v50, %s1748_s27  ;;  %v379_v14 = vsel %vm46_vm0, %v374_v2, %v375_v63 }
  0x8a   :  { %v431_v53 = vpop.permute.xlu1 %430  ;;  %v1981_v20 = vsel %vm377_vm11, %v379_v14, %v1903_v48 }
  0x8b   :  { %v434_v58 = vrot.slane %v431_v53, 4  ;;  %v387_v30 = vmul.f32 %v1877_v39, %v1981_v20 }
  0x8c   :  { %v1923_v56 = vpop.permute.xlu0 %273 }
  0x8d   :  { %337 = vrot.lane.b32.xlu0 %v1914_v52, %s1745_s24  ;;  %494 = vrot.lane.b32.xlu1 %v488_v55, %s1744_s23  ;;  %v439_v0 = vsel %vm46_vm0, %v433_v43, %v434_v58  ;;  %v279_v26 = vrot.slane %v1923_v56, 4 }
  0x8e   :  { %v1931_v59 = vpop.permute.xlu1 %275  ;;  %v1952_v7 = vsel %vm435_vm9, %v439_v0, %v431_v53  ;;  %v444_v0 = vmul.f32 %v1914_v52, %v2047_v34  ;;  %vm136_vm9 = vcmask 924672  }
  0x8f   :  { %v1973_v18 = vmul.f32 %v1865_v28, %v1952_v7  ;;  %v280_v22 = vrot.slane %v1931_v59, 4  ;;  %v2082_v14 = vsel %vm282_vm13, %v279_v26, %v1923_v56 }
  0x90   :  { %v1938_v62 = vpop.permute.xlu0 %215 }
  0x91   :  { %163 = vrot.lane.b32.xlu0 %v1914_v52, %s1746_s25  ;;  %343 = vrot.lane.b32.xlu1 %v335_v60, %s1745_s24  ;;  %v221_v4 = vrot.slane %v1938_v62, 4  ;;  %v284_v33 = vsel %vm46_vm0, %v279_v26, %v280_v22  ;;  %v539_v60 = vmul.f32 %v2030_v57, %v1914_v52 }
  0x92   :  { %v218_v1 = vpop.permute.xlu1 %217  ;;  %v2018_v43 = vsel %vm282_vm13, %v284_v33, %v1931_v59  ;;  %v336_v33 = vcombine.high %v1865_v28, %v1865_v28 }
  0x93   :  { %v222_v5 = vrot.slane %v218_v1, 4  ;;  %v292_v53 = vmul.f32 %v1877_v39, %v2018_v43 }
  0x94   :  { %v1954_v8 = vpop.permute.xlu0 %277 }
  0x95   :  { %v226_v15 = vsel %vm46_vm0, %v221_v4, %v222_v5  ;;  %552 = vrot.lane.b32.xlu0 %v1949_v6, %s1747_s26 }
  0x96   :  { %v1967_v16 = vsel %vm224_vm10, %v226_v15, %v218_v1  ;;  %v1969_v17 = vpop.permute.xlu1 %97  ;;  %v2068_v1 = vsel %vm377_vm11, %v374_v2, %v1894_v46  ;;  %v393_v2 = vcombine.low %v387_v30, %v387_v30  ;;  %v2095_v15 = vsel %vm224_vm10, %v221_v4, %v1938_v62 }
  0x97   :  { %v1977_v19 = vmul.f32 %v1877_v39, %v1967_v16  ;;  %v103_v23 = vrot.slane %v1969_v17, 4  ;;  %v298_v62 = vcombine.low %v292_v53, %v292_v53 }
  0x98   :  { %v100_v21 = vpop.permute.xlu0 %99 }
  0x99   :  { %v104_v24 = vrot.slane %v100_v21, 4  ;;  %461 = vrot.lane.b32.xlu0 %v1973_v18, %s1748_s27  ;;  %246 = vrot.lane.b32.xlu1 %v1977_v19, %s1749_s28 }
  0x9a   :  { %v220_v25 = vpop.permute.xlu1 %219 }
  0x9b   :  { %v108_v27 = vsel %vm46_vm0, %v103_v23, %v104_v24  ;;  %v223_v29 = vrot.slane %v220_v25, 4 }
  0x9c   :  { %v1996_v31 = vsel %vm106_vm12, %v108_v27, %v100_v21  ;;  %v102_v32 = vpop.permute.xlu0 %101  ;;  %v545_v27 = vcombine.high %v539_v60, %v539_v60 }
  0x9d   :  { %v228_v35 = vsel %vm46_vm0, %v222_v5, %v223_v29  ;;  %v105_v36 = vrot.slane %v102_v32, 4  ;;  %401 = vrot.lane.b32.xlu0 %v387_v30, %s1750_s29  ;;  %v2005_v37 = vmul.f32 %v1877_v39, %v1996_v31  ;;  %v451_v5 = vcombine.high %v1910_v50, %v1910_v50 }
  0x9e   :  { %v2008_v38 = vsel %vm224_vm10, %v228_v35, %v220_v25  ;;  %v281_v50 = vrot.slane %v1954_v8, 4  ;;  %v2108_v25 = vsel %vm106_vm12, %v103_v23, %v1969_v17  ;;  %v240_v17 = vcombine.high %v1977_v19, %v1977_v19 }
  0x9f   :  { %128 = vrot.lane.b32.xlu1 %v2005_v37, %s1751_s30  ;;  %v2014_v40 = vmul.f32 %v1865_v28, %v2008_v38  ;;  %v110_v47 = vsel %vm46_vm0, %v104_v24, %v105_v36  ;;  %v233_v24 = vmul.f32 %v1914_v52, %v2095_v15  ;;  %v115_v59 = vmul.f32 %v1914_v52, %v2108_v25 }
  0xa0   :  { %v2033_v58 = vsel %vm106_vm12, %v110_v47, %v102_v32  ;;  %v286_v21 = vsel %vm46_vm0, %v280_v22, %v281_v50  ;;  %v546_v23 = vcombine.high %v1949_v6, %v1949_v6  ;;  %v122_v26 = vcombine.high %v2005_v37, %v2005_v37  ;;  %v2158_v37 = vpop.permute.xlu1 %498  ;;  %v602_v47 = vld [vmem:[%s2593_s6] sm:$0xf] }
  0xa1   :  { %250 = vrot.lane.b32.xlu0 %v2014_v40, %s1749_s28  ;;  %v2041_v39 = vmul.f32 %v1865_v28, %v2033_v58  ;;  %v2113_v4 = vsel %vm282_vm13, %v286_v21, %v1954_v8  ;;  %v450_v19 = vcombine.high %v444_v0, %v444_v0  ;;  %v239_v6 = vcombine.high %v233_v24, %v233_v24 }
  0xa2   :  { %v293_v22 = vmul.f32 %v1865_v28, %v2113_v4  ;;  %v452_v32 = vcombine.high %v1973_v18, %v1973_v18  ;;  %v241_v35 = vcombine.high %v2014_v40, %v2014_v40  ;;  %v1753_v36 = vmov 0  }
  0xa3   :  { %165 = vrot.lane.b32.xlu1 %v488_v55, %s1746_s25  ;;  %v376_v55 = vrot.slane %v1912_v51, 4  ;;  %v123_v18 = vcombine.high %v2041_v39, %v2041_v39  ;;  %1721 = vset.pattern.permute.xlu0 %v1753_v36  ;;  %vm608_vm10 = vcmask 293888   ;;  %vm947_vm12 = vcmask 1043712  }
  0xa4   :  { %v299_v8 = vcombine.low %v293_v22, %v293_v22  ;;  %1720 = vset.pattern.permute.xlu1 %v1753_v36  ;;  %v2163_v40 = vpop.permute.xlu1 %169  ;;  %vm938_vm13 = vcmask 261120   ;;  %vm948_vm5 = vmor %vm63_vm4, %vm947_vm12 }
  0xa5   :  { %306 = vrot.lane.b32.xlu0 %v292_v53, %s1752_s14  ;;  %v381_v41 = vsel %vm46_vm0, %v375_v63, %v376_v55  ;;  %v386_v63 = vmul.f32 %v1914_v52, %v2068_v1  ;;  %v2165_v53 = vpop.permute.xlu0 %345 }
  0xa6   :  { %v2075_v48 = vsel %vm377_vm11, %v381_v41, %v1912_v51  ;;  %v291_v51 = vmul.f32 %v1914_v52, %v2082_v14  ;;  %v547_v52 = vcombine.high %v1892_v45, %v1892_v45  ;;  %v121_v45 = vcombine.high %v115_v59, %v115_v59 }
  0xa7   :  { %548 = vrot.lane.b32.xlu1 %v539_v60, %s1747_s26  ;;  %v388_v46 = vmul.f32 %v1865_v28, %v2075_v48  ;;  %v392_v29 = vcombine.low %v386_v63, %v386_v63  ;;  %vm2606_vm11 = vmmov 0  }
  0xa8   :  { %v297_v30 = vcombine.low %v291_v51, %v291_v51 }
  0xa9   :  { %132 = vrot.lane.b32.xlu0 %v2041_v39, %s1751_s30  ;;  %v394_v56 = vcombine.low %v388_v46, %v388_v46 }
  0xab   :  { %490 = vrot.lane.b32.xlu1 %v487_v54, %s1744_s23 }
  0xad   :  { %453 = vrot.lane.b32.xlu0 %v444_v0, %s1748_s27 }
  0xaf   :  { %161 = vrot.lane.b32.xlu1 %v487_v54, %s1746_s25 }
  0xb1   :  { %339 = vrot.lane.b32.xlu0 %v334_v44, %s1745_s24 }
  0xb3   :  { %459 = vrot.lane.b32.xlu1 %v451_v5, %s1748_s27 }
  0xb5   :  { %397 = vrot.lane.b32.xlu0 %v386_v63, %s1750_s29 }
  0xb7   :  { %399 = vrot.lane.b32.xlu1 %v393_v2, %s1750_s29 }
  0xb9   :  { %302 = vrot.lane.b32.xlu0 %v291_v51, %s1752_s14 }
  0xbb   :  { %403 = vrot.lane.b32.xlu1 %v394_v56, %s1750_s29 }
  0xbd   :  { %242 = vrot.lane.b32.xlu0 %v233_v24, %s1749_s28 }
  0xbf   :  { %304 = vrot.lane.b32.xlu1 %v298_v62, %s1752_s14 }
  0xc1   :  { %124 = vrot.lane.b32.xlu0 %v115_v59, %s1751_s30 }
  0xc3   :  { %248 = vrot.lane.b32.xlu1 %v240_v17, %s1749_s28 }
  0xc5   :  { %554 = vrot.lane.b32.xlu0 %v546_v23, %s1747_s26 }
  0xc7   :  { %308 = vrot.lane.b32.xlu1 %v299_v8, %s1752_s14 }
  0xc9   :  { %558 = vrot.lane.b32.xlu0 %v547_v52, %s1747_s26 }
  0xcb   :  { %130 = vrot.lane.b32.xlu1 %v122_v26, %s1751_s30 }
  0xcd   :  { %455 = vrot.lane.b32.xlu0 %v450_v19, %s1748_s27 }
  0xcf   :  { %550 = vrot.lane.b32.xlu1 %v545_v27, %s1747_s26 }
  0xd1   :  { %244 = vrot.lane.b32.xlu0 %v239_v6, %s1749_s28 }
  0xd3   :  { %395 = vrot.lane.b32.xlu1 %v392_v29, %s1750_s29 }
  0xd5   :  { %126 = vrot.lane.b32.xlu0 %v121_v45, %s1751_s30 }
  0xd7   :  { %300 = vrot.lane.b32.xlu1 %v297_v30, %s1752_s14 }
  0xd9   :  { %500 = vrot.lane.b32.xlu0 %v1865_v28, %s1744_s23 }
  0xdb   :  { %463 = vrot.lane.b32.xlu1 %v452_v32, %s1748_s27 }
  0xdd   :  { %405 = vrot.lane.b32.xlu0 %v388_v46, %s1750_s29 }
  0xdf   :  { %347 = vrot.lane.b32.xlu1 %v336_v33, %s1745_s24 }
  0xe1   :  { %310 = vrot.lane.b32.xlu0 %v293_v22, %s1752_s14 }
  0xe3   :  { %252 = vrot.lane.b32.xlu1 %v241_v35, %s1749_s28 }
  0xe5   :  { %171 = vrot.lane.b32.xlu0 %v1865_v28, %s1746_s25 }
  0xe7   :  { %134 = vrot.lane.b32.xlu1 %v123_v18, %s1751_s30 }
  0xeb   :  { %605 = vperm.xlu1 %1720, %v602_v47  }
  0xf3   :  { %v342_v28 = vpop.permute.xlu1 %341  ;;  %v497_v60 = vpop.permute.xlu0 %496 }
  0xf4   :  { %v506_v39 = vsel %vm502_vm14, %v497_v60, %v2158_v37 }
  0xf5   :  { %516 = vst [vmem:[#allocation3 + $0x90] sm:$0xf0] %v506_v39 }
  0xf7   :  { %v2169_v54 = vpop.permute.xlu1 %556  ;;  %v168_v55 = vpop.permute.xlu0 %167 }
  0xf8   :  { %v177_v0 = vsel %vm173_vm15, %v168_v55, %v2163_v40 }
  0xf9   :  { %187 = vst [vmem:[#allocation3 + $0x48] sm:$0xf0] %v177_v0 }
  0xfb   :  { %v2173_v41 = vpop.permute.xlu1 %457  ;;  %v493_v44 = vpop.permute.xlu0 %492 }
  0xff   :  { %v495_v5 = vpop.permute.xlu1 %494  ;;  %v338_v63 = vpop.permute.xlu0 %337 }
 0x100   :  { %v504_v46 = vsel %vm502_vm14, %v493_v44, %v495_v5  ;;  %v505_v2 = vsel %vm502_vm14, %v495_v5, %v497_v60 }
 0x101   :  { %514 = vst [vmem:[#allocation3 + $0x20] sm:$0xf0] %v504_v46  ;;  %515 = vst [vmem:[#allocation3 + $0x30] sm:$0xf0] %v505_v2 }
 0x103   :  { %v344_v50 = vpop.permute.xlu1 %343  ;;  %v164_v51 = vpop.permute.xlu0 %163 }
 0x104   :  { %v352_v56 = vsel %vm349_vm1, %v342_v28, %v344_v50  ;;  %v353_v21 = vsel %vm349_vm1, %v344_v50, %v2165_v53 }
 0x105   :  { %362 = vst [vmem:[#allocation3 + $0x18] sm:$0xf] %v352_v56  ;;  %363 = vst [vmem:[#allocation3 + $0x68] sm:$0xf] %v353_v21 }
 0x107   :  { %v2180_v24 = vpop.permute.xlu0 %552 }
 0x10b   :  { %v2182_v62 = vpop.permute.xlu0 %461  ;;  %v2184_v59 = vpop.permute.xlu1 %246 }
 0x10f   :  { %v402_v22 = vpop.permute.xlu0 %401 }
 0x111   :  { %v2186_v17 = vpop.permute.xlu1 %128 }
 0x113   :  { %v2188_v23 = vpop.permute.xlu0 %250 }
 0x115   :  { %v166_v8 = vpop.permute.xlu1 %165 }
 0x116   :  { %v175_v52 = vsel %vm173_vm15, %v164_v51, %v166_v8  ;;  %v176_v26 = vsel %vm173_vm15, %v166_v8, %v168_v55 }
 0x117   :  { %185 = vst [vmem:[#allocation3] sm:$0xf0] %v175_v52  ;;  %186 = vst [vmem:[#allocation3 + $0x10] sm:$0xf0] %v176_v26  ;;  %v307_v19 = vpop.permute.xlu0 %306 }
 0x119   :  { %v2192_v27 = vpop.permute.xlu1 %548 }
 0x11b   :  { %v2194_v6 = vpop.permute.xlu0 %132 }
 0x11d   :  { %v491_v29 = vpop.permute.xlu1 %490 }
 0x11e   :  { %v503_v45 = vsel %vm502_vm14, %v491_v29, %v493_v44 }
 0x11f   :  { %513 = vst [vmem:[#allocation3 + $0xa0] sm:$0xf0] %v503_v45  ;;  %v454_v30 = vpop.permute.xlu0 %453 }
 0x121   :  { %v162_v32 = vpop.permute.xlu1 %161 }
 0x122   :  { %v174_v33 = vsel %vm173_vm15, %v162_v32, %v164_v51 }
 0x123   :  { %184 = vst [vmem:[#allocation3 + $0xb0] sm:$0xf0] %v174_v33  ;;  %v340_v35 = vpop.permute.xlu0 %339 }
 0x124   :  { %v350_v18 = vsel %vm349_vm1, %v338_v63, %v340_v35  ;;  %v351_v36 = vsel %vm349_vm1, %v340_v35, %v342_v28 }
 0x125   :  { %360 = vst [vmem:[#allocation3 + $0xb8] sm:$0xf] %v350_v18  ;;  %361 = vst [vmem:[#allocation3 + $0x70] sm:$0xf] %v351_v36  ;;  %v460_v47 = vpop.permute.xlu1 %459 }
 0x126   :  { %v468_v60 = vsel %vm465_vm2, %v2173_v41, %v460_v47  ;;  %v469_v39 = vsel %vm465_vm2, %v460_v47, %v2182_v62 }
 0x127   :  { %478 = vst [vmem:[#allocation3 + $0x30] sm:$0xf] %v468_v60  ;;  %479 = vst [vmem:[#allocation3 + $0x90] sm:$0xf] %v469_v39  ;;  %v2204_v55 = vpop.permute.xlu0 %397 }
 0x129   :  { %v400_v0 = vpop.permute.xlu1 %399 }
 0x12a   :  { %v409_v44 = vsel %vm407_vm3, %v2204_v55, %v400_v0  ;;  %v410_v28 = vsel %vm407_vm3, %v400_v0, %v402_v22 }
 0x12b   :  { %419 = vst [vmem:[#allocation3 + $0x70] sm:$0xf0] %v409_v44  ;;  %420 = vst [vmem:[#allocation3 + $0x18] sm:$0xf0] %v410_v28  ;;  %v2209_v5 = vpop.permute.xlu0 %302 }
 0x12d   :  { %v2211_v63 = vpop.permute.xlu1 %403 }
 0x12e   :  { %v411_v46 = vsel %vm407_vm3, %v402_v22, %v2211_v63 }
 0x12f   :  { %421 = vst [vmem:[#allocation3 + $0x68] sm:$0xf0] %v411_v46  ;;  %v243_v2 = vpop.permute.xlu0 %242 }
 0x131   :  { %v305_v50 = vpop.permute.xlu1 %304 }
 0x132   :  { %v314_v51 = vsel %vm312_vm6, %v2209_v5, %v305_v50  ;;  %v315_v56 = vsel %vm312_vm6, %v305_v50, %v307_v19 }
 0x133   :  { %324 = vst [vmem:[#allocation3 + $0x40] sm:$0xf0] %v314_v51  ;;  %325 = vst [vmem:[#allocation3 + $0x78] sm:$0xf0] %v315_v56  ;;  %v125_v21 = vpop.permute.xlu0 %124  ;;  %v595_v51 = vld [vmem:[#allocation3 + $0x90] sm:$0xff] }
 0x135   :  { %v249_v8 = vpop.permute.xlu1 %248 }
 0x136   :  { %v257_v52 = vsel %vm254_vm7, %v2184_v59, %v249_v8  ;;  %v258_v22 = vsel %vm254_vm7, %v249_v8, %v2188_v23 }
 0x137   :  { %267 = vst [vmem:[#allocation3 + $0x78] sm:$0xf] %v257_v52  ;;  %268 = vst [vmem:[#allocation3 + $0x80] sm:$0xf] %v258_v22  ;;  %v555_v26 = vpop.permute.xlu0 %554  ;;  %v590_v52 = vld [vmem:[#allocation3 + $0x68] sm:$0xff] }
 0x138   :  { %v563_v29 = vsel %vm560_vm8, %v2180_v24, %v555_v26  ;;  %v564_v45 = vsel %vm560_vm8, %v555_v26, %v2169_v54 }
 0x139   :  { %573 = vst [vmem:[#allocation3 + $0x8] sm:$0xf] %v563_v29  ;;  %574 = vst [vmem:[#allocation3 + $0xa8] sm:$0xf] %v564_v45  ;;  %v2226_v32 = vpop.permute.xlu1 %308 }
 0x13a   :  { %v316_v33 = vsel %vm312_vm6, %v307_v19, %v2226_v32 }
 0x13b   :  { %326 = vst [vmem:[#allocation3 + $0x80] sm:$0xf0] %v316_v33  ;;  %v559_v35 = vpop.permute.xlu0 %558 }
 0x13c   :  { %v565_v18 = vsel %vm560_vm8, %v2169_v54, %v559_v35  ;;  %v2256_v35 = vld [vmem:[%s2594_s5] sm:$0xf] }
 0x13d   :  { %575 = vst [vmem:[#allocation3 + $0xc0] sm:$0xf] %v565_v18  ;;  %v131_v36 = vpop.permute.xlu1 %130 }
 0x13e   :  { %v139_v47 = vsel %vm136_vm9, %v2186_v17, %v131_v36  ;;  %v140_v60 = vsel %vm136_vm9, %v131_v36, %v2194_v6  ;;  %v584_v45 = vld [vmem:[#allocation3 + $0x78] sm:$0xff] }
 0x13f   :  { %149 = vst [vmem:[#allocation3 + $0x10] sm:$0xf] %v139_v47  ;;  %150 = vst [vmem:[#allocation3 + $0x48] sm:$0xf] %v140_v60  ;;  %v456_v39 = vpop.permute.xlu0 %455 }
 0x140   :  { %v466_v0 = vsel %vm465_vm2, %v454_v30, %v456_v39  ;;  %v467_v19 = vsel %vm465_vm2, %v456_v39, %v2173_v41  ;;  %v600_v44 = vld [vmem:[#allocation3 + $0xa8] sm:$0xf]  ;;  %v594_v30 = vld [vmem:[#allocation3 + $0x30] sm:$0xff] }
 0x141   :  { %v599_v28 = vld [vmem:[#allocation3 + $0x8] sm:$0xf]  ;;  %476 = vst [vmem:[#allocation3 + $0xa0] sm:$0xf] %v466_v0  ;;  %477 = vst [vmem:[#allocation3 + $0x20] sm:$0xf] %v467_v19  ;;  %v551_v54 = vpop.permute.xlu1 %550  ;;  %1645 = vmatprep.subr.msk.mxu1 %vm46_vm0, %v600_v44 }
 0x142   :  { %v561_v46 = vsel %vm560_vm8, %v2192_v27, %v551_v54  ;;  %v562_v50 = vsel %vm560_vm8, %v551_v54, %v2180_v24  ;;  %1646 = vmatpush1.msk.msra.mxu1 %vm46_vm0, %v599_v28  ;;  %v589_v24 = vld [vmem:[#allocation3 + $0x18] sm:$0xff]  ;;  %v585_v26 = vld [vmem:[#allocation3 + $0x80] sm:$0xff]  ;;  %v588_v44 = vld [vmem:[#allocation3 + $0x70] sm:$0xff] }
 0x143   :  { %571 = vst [vmem:[#allocation3 + $0x58] sm:$0xf] %v561_v46  ;;  %572 = vst [vmem:[#allocation3 + $0x50] sm:$0xf] %v562_v50  ;;  %722 = vmatprep.subr.mxu1 %v595_v51  ;;  %v245_v41 = vpop.permute.xlu0 %244 }
 0x144   :  { %v255_v56 = vsel %vm254_vm7, %v243_v2, %v245_v41  ;;  %v256_v8 = vsel %vm254_vm7, %v245_v41, %v2184_v59  ;;  %723 = vmatpush1.msra.mxu1 %v594_v30 }
 0x145   :  { %265 = vst [vmem:[#allocation3 + $0x28] sm:$0xf] %v255_v56  ;;  %266 = vst [vmem:[#allocation3 + $0x40] sm:$0xf] %v256_v8  ;;  %v396_v27 = vpop.permute.xlu1 %395  ;;  %724 = vmatprep.subr.mxu1 %v590_v52 }
 0x146   :  { %v408_v22 = vsel %vm407_vm3, %v396_v27, %v2204_v55  ;;  %725 = vmatpush1.msra.mxu1 %v589_v24  ;;  %v580_v33 = vld [vmem:[#allocation3 + $0x48] sm:$0xff]  ;;  %v579_v18 = vld [vmem:[#allocation3 + $0x10] sm:$0xff] }
 0x147   :  { %418 = vst [vmem:[#allocation3 + $0xb8] sm:$0xf0] %v408_v22  ;;  %726 = vmatprep.subr.mxu1 %v585_v26  ;;  %v127_v29 = vpop.permute.xlu0 %126 }
 0x148   :  { %v137_v2 = vsel %vm136_vm9, %v125_v21, %v127_v29  ;;  %v138_v59 = vsel %vm136_vm9, %v127_v29, %v2186_v17  ;;  %727 = vmatpush1.msra.mxu1 %v584_v45  ;;  %v593_v39 = vld [vmem:[#allocation3 + $0x20] sm:$0xff] }
 0x149   :  { %147 = vst [vmem:[#allocation3 + $0xb0] sm:$0xf] %v137_v2  ;;  %148 = vst [vmem:[#allocation3] sm:$0xf] %v138_v59  ;;  %v301_v55 = vpop.permute.xlu1 %300  ;;  %728 = vmatprep.subr.mxu1 %v580_v33  ;;  %v592_v0 = vld [vmem:[#allocation3 + $0xa0] sm:$0xff] }
 0x14a   :  { %v313_v36 = vsel %vm312_vm6, %v301_v55, %v2209_v5  ;;  %729 = vmatpush1.msra.mxu1 %v579_v18  ;;  %v598_v21 = vld [vmem:[#allocation3 + $0x50] sm:$0xf]  ;;  %v597_v47 = vld [vmem:[#allocation3 + $0x58] sm:$0xf] }
 0x14b   :  { %323 = vst [vmem:[#allocation3 + $0x28] sm:$0xf0] %v313_v36  ;;  %1642 = vmatprep.subr.msk.mxu0 %vm46_vm0, %v598_v21  ;;  %v501_v17 = vpop.permute.xlu0 %500  ;;  %1647 = vmatmul.mubr.msk.f32.vlgmr.msra.gmra.mxu1 %vm608_vm10, %v2256_v35 }
 0x14c   :  { %v507_v60 = vsel %vm502_vm14, %v2158_v37, %v501_v17  ;;  %1643 = vmatpush1.msk.msra.mxu0 %vm46_vm0, %v597_v47  ;;  %1410 = vmatprep.mubr.f32.mxu1 %v1736_v3  ;;  %v583_v46 = vld [vmem:[#allocation3 + $0x40] sm:$0xff] }
 0x14d   :  { %517 = vst [vmem:[#allocation3 + $0x38] sm:$0xf0] %v507_v60  ;;  %v464_v5 = vpop.permute.xlu1 %463  ;;  %651 = vmatprep.subr.mxu0 %v593_v39 }
 0x14e   :  { %v470_v19 = vsel %vm465_vm2, %v2182_v62, %v464_v5  ;;  %652 = vmatpush1.msra.mxu0 %v592_v0  ;;  %v587_v28 = vld [vmem:[#allocation3 + $0xb8] sm:$0xff] }
 0x14f   :  { %480 = vst [vmem:[#allocation3 + $0x38] sm:$0xf] %v470_v19  ;;  %653 = vmatprep.subr.mxu0 %v588_v44  ;;  %v406_v54 = vpop.permute.xlu0 %405 }
 0x150   :  { %v412_v37 = vsel %vm407_vm3, %v2211_v63, %v406_v54  ;;  %654 = vmatpush1.msra.mxu0 %v587_v28  ;;  %v578_v30 = vld [vmem:[#allocation3] sm:$0xff]  ;;  %v577_v8 = vld [vmem:[#allocation3 + $0xb0] sm:$0xff] }
 0x151   :  { %422 = vst [vmem:[#allocation3 + $0x98] sm:$0xf0] %v412_v37  ;;  %v348_v50 = vpop.permute.xlu1 %347  ;;  %655 = vmatprep.subr.mxu0 %v583_v46 }
 0x152   :  { %v354_v51 = vsel %vm349_vm1, %v2165_v53, %v348_v50  ;;  %v582_v41 = vld [vmem:[#allocation3 + $0x28] sm:$0xff]  ;;  %v601_v53 = vld [vmem:[#allocation3 + $0xc0] sm:$0xf] }
 0x153   :  { %364 = vst [vmem:[#allocation3 + $0x98] sm:$0xf] %v354_v51  ;;  %656 = vmatpush1.msra.mxu0 %v582_v41  ;;  %v311_v62 = vpop.permute.xlu0 %310 }
 0x154   :  { %v317_v56 = vsel %vm312_vm6, %v2226_v32, %v311_v62  ;;  %657 = vmatprep.subr.mxu0 %v578_v30 }
 0x155   :  { %327 = vst [vmem:[#allocation3 + $0x88] sm:$0xf0] %v317_v56  ;;  %v253_v63 = vpop.permute.xlu1 %252  ;;  %658 = vmatpush1.msra.mxu0 %v577_v8 }
 0x156   :  { %v259_v52 = vsel %vm254_vm7, %v2188_v23, %v253_v63  ;;  %1644 = vmatmul.mubr.msk.f32.vlgmr.msra.gmra.mxu0 %vm608_vm10, %v2256_v35  ;;  %1674 = vmatprep.subr.mxu0 %v1736_v3  ;;  %v596_v23 = vld [vmem:[#allocation3 + $0x38] sm:$0xff] }
 0x157   :  { %269 = vst [vmem:[#allocation3 + $0x88] sm:$0xf] %v259_v52  ;;  %1675 = vmatpush3.msk.msra.mxu0 %vm46_vm0, %v601_v53  ;;  %v172_v27 = vpop.permute.xlu0 %171  ;;  %1684 = vmatprep.mubr.msk.f32.mxu0 %vm2606_vm11, %v1736_v3  ;;  %vm951_vm11 = vcmask 261124  }
 0x158   :  { %v178_v32 = vsel %vm173_vm15, %v2163_v40, %v172_v27  ;;  %1676 = vmatprep.subr.mxu0 %v1736_v3  ;;  %vm952_vm4 = vmor %vm951_vm11, %vm46_vm0 }
 0x159   :  { %188 = vst [vmem:[#allocation3 + $0x60] sm:$0xf0] %v178_v32  ;;  %v135_v24 = vpop.permute.xlu1 %134  ;;  %1677 = vmatpush3.msra.mxu0 %v596_v23 }
 0x15a   :  { %v141_v22 = vsel %vm136_vm9, %v2194_v6, %v135_v24  ;;  %1678 = vmatprep.subr.mxu0 %v1736_v3  ;;  %v591_v26 = vld [vmem:[#allocation3 + $0x98] sm:$0xff] }
 0x15b   :  { %151 = vst [vmem:[#allocation3 + $0x60] sm:$0xf] %v141_v22  ;;  %1679 = vmatpush3.msra.mxu0 %v591_v26  ;;  %v1641_v6 = vld [vmem:[%s2592_s9 + $0x2] ss:$4 sm:$0x1f] }
 0x15c   :  { %1680 = vmatprep.subr.mxu0 %v1736_v3  ;;  %v851_v45 = vrot.slane %v1641_v6, %v1851_v12  ;;  %v855_v55 = vrot.slane %v1641_v6, %v1853_v13  ;;  %v843_v12 = vrot.slane %v1641_v6, %v1847_v10  ;;  %v847_v39 = vrot.slane %v1641_v6, %v1849_v11 }
 0x15d   :  { %v859_v28 = vrot.slane %v1641_v6, %v1845_v9 }
 0x15e   :  { %v586_v29 = vld [vmem:[#allocation3 + $0x88] sm:$0xff] }
 0x15f   :  { %1681 = vmatpush3.msra.mxu0 %v586_v29 }
 0x160   :  { %1682 = vmatprep.subr.mxu0 %v1736_v3 }
 0x162   :  { %v581_v40 = vld [vmem:[#allocation3 + $0x60] sm:$0xff] }
 0x163   :  { %1683 = vmatpush3.msra.mxu0 %v581_v40 }
 0x164   :  { %1685 = vmatmul.mubr.msk.f32.vlgmr.msra.gmra.mxu0 %vm608_vm10, %v2256_v35 }
 0x165   :  { %1481 = vmatprep.mubr.f32.mxu0 %v1736_v3 }
 0x166   :  { %v606_v59 = vpop.permute.xlu1 %605 }
 0x20b   :  { %v764_v2 = vpop.f32.mrf.mxu1 }
 0x20c   :  { %v765_v33 = vadd.f32 %v764_v2, %v606_v59 }
 0x20d   :  { %v766_v18 = vpop.f32.mrf.mxu1 }
 0x20e   :  { %v767_v36 = vadd.f32 %v766_v18, %v606_v59  ;;  %v2299_v21 = vmul.f32 %v851_v45, %v765_v33 }
 0x210   :  { %v2301_v47 = vmul.f32 %v855_v55, %v767_v36 }
 0x212   :  { %v928_v35 = vcombine.low %v2299_v21, %v2301_v47 }
 0x214   :  { %931 = vrot.lane.b32.xlu1 %v928_v35, %s1755_s20 }
 0x216   :  { %v693_v17 = vpop.f32.mrf.mxu0 }
 0x217   :  { %v694_v60 = vadd.f32 %v693_v17, %v606_v59 }
 0x218   :  { %v695_v5 = vpop.f32.mrf.mxu0 }
 0x219   :  { %v696_v13 = vadd.f32 %v695_v5, %v606_v59  ;;  %v2308_v0 = vmul.f32 %v843_v12, %v694_v60 }
 0x21b   :  { %v2310_v19 = vmul.f32 %v847_v39, %v696_v13 }
 0x21d   :  { %v927_v44 = vcombine.low %v2308_v0, %v2310_v19 }
 0x21f   :  { %929 = vrot.lane.b32.xlu0 %v927_v44, %s1755_s20 }
 0x224   :  { %v835_v54 = vpop.f32.mrf.mxu0 }
 0x225   :  { %v836_v37 = vadd.f32 %v835_v54, %v606_v59 }
 0x226   :  { %v1686_v46 = vpop.f32.mrf.mxu0 }
 0x227   :  { %v2316_v50 = vmul.f32 %v859_v28, %v836_v37  ;;  %v1322_v37 = vld [vmem:[%s2595_s8] sm:$0xf] }
 0x229   :  { %933 = vrot.lane.b32.xlu0 %v2316_v50, %s1755_s20 }
 0x286   :  { %v932_v10 = vpop.permute.xlu1 %931 }
 0x287   :  { %v936_v11 = vrot.slane %v932_v10, 4 }
 0x291   :  { %v930_v51 = vpop.permute.xlu0 %929 }
 0x292   :  { %v935_v41 = vrot.slane %v930_v51, 4 }
 0x294   :  { %v939_v62 = vsel %vm938_vm13, %v935_v41, %v930_v51  ;;  %v940_v9 = vsel %vm46_vm0, %v935_v41, %v936_v11 }
 0x295   :  { %v941_v30 = vsel %vm938_vm13, %v940_v9, %v932_v10  ;;  %949 = vst.msk [vmem:[#allocation2] sm:$0xff] %vm948_vm5, %v939_v62  ;;  %v873_v10 = vrot.slane %v2299_v21, 4  ;;  %vm2607_vm5 = vmmov 0  }
 0x296   :  { %950 = vst [vmem:[#allocation2 + $0x8] sm:$0xff] %v941_v30  ;;  %1120 = vrot.lane.b32.xlu1 %v941_v30, %s1745_s24  ;;  %v1000_v24 = vcombine.low %v941_v30, %v941_v30  ;;  %v1033_v26 = vmul.f32 %v941_v30, %v1967_v16  ;;  %v1114_v6 = vcombine.high %v941_v30, %v941_v30 }
 0x298   :  { %v1039_v36 = vcombine.high %v1033_v26, %v1033_v26 }
 0x29a   :  { %1008 = vrot.lane.b32.xlu1 %v941_v30, %s1746_s25 }
 0x29b   :  { %v934_v56 = vpop.permute.xlu0 %933 }
 0x29c   :  { %v937_v8 = vrot.slane %v934_v56, 4  ;;  %v1221_v63 = vld [vmem:[#allocation2] sm:$0xff] }
 0x29d   :  { %1232 = vrot.lane.b32.xlu0 %v1221_v63, %s1744_s23  ;;  %v1260_v52 = vmul.f32 %v1221_v63, %v2030_v57  ;;  %v1227_v32 = vcombine.low %v1221_v63, %v1221_v63  ;;  %v1186_v57 = vmul.f32 %v941_v30, %v1906_v49  ;;  %v1185_v23 = vmul.f32 %v1221_v63, %v2047_v34 }
 0x29e   :  { %v942_v53 = vsel %vm46_vm0, %v936_v11, %v937_v8  ;;  %v1113_v22 = vcombine.high %v1221_v63, %v1221_v63  ;;  %v1146_v29 = vmul.f32 %v1221_v63, %v2068_v1  ;;  %v958_v49 = vmul.f32 %v941_v30, %v1996_v31  ;;  %v1735_v11 = vld [vmem:[%s2591_s0 + $0x8] sm:$0xff] }
 0x29f   :  { %v943_v27 = vsel %vm938_vm13, %v942_v53, %v934_v56  ;;  %1269 = vrot.lane.b32.xlu1 %v1260_v52, %s1747_s26  ;;  %v1071_v34 = vmul.f32 %v1221_v63, %v2082_v14  ;;  %v1032_v40 = vmul.f32 %v1221_v63, %v2095_v15  ;;  %v957_v16 = vmul.f32 %v1221_v63, %v2108_v25 }
 0x2a0   :  { %953 = vst.msk [vmem:[#allocation2 + $0x10] sm:$0xff] %vm952_vm4, %v943_v27  ;;  %v1147_v31 = vmul.f32 %v941_v30, %v1981_v20  ;;  %v1261_v1 = vmul.f32 %v941_v30, %v1936_v61  ;;  %v1072_v14 = vmul.f32 %v941_v30, %v2018_v43  ;;  %v1191_v15 = vcombine.high %v1185_v23, %v1185_v23 }
 0x2a1   :  { %1116 = vrot.lane.b32.xlu0 %v1221_v63, %s1745_s24  ;;  %v1266_v45 = vcombine.high %v1260_v52, %v1260_v52  ;;  %v1038_v25 = vcombine.high %v1032_v40, %v1032_v40  ;;  %v1152_v2 = vcombine.low %v1146_v29, %v1146_v29  ;;  %v963_v20 = vcombine.high %v957_v16, %v957_v16 }
 0x2a2   :  { %v1077_v61 = vcombine.low %v1071_v34, %v1071_v34  ;;  %v1267_v59 = vcombine.high %v1261_v1, %v1261_v1  ;;  %v1153_v43 = vcombine.low %v1147_v31, %v1147_v31  ;;  %v1192_v33 = vcombine.high %v1186_v57, %v1186_v57 }
 0x2a3   :  { %1230 = vrot.lane.b32.xlu1 %v1227_v32, %s1744_s23  ;;  %v1078_v55 = vcombine.low %v1072_v14, %v1072_v14  ;;  %v964_v35 = vcombine.high %v958_v49, %v958_v49 }
 0x2a5   :  { %1004 = vrot.lane.b32.xlu0 %v1221_v63, %s1746_s25 }
 0x2a7   :  { %1002 = vrot.lane.b32.xlu1 %v1227_v32, %s1746_s25  ;;  %v1109_v18 = vld [vmem:[#allocation2 + $0x10] sm:$0xff] }
 0x2a8   :  { %v1034_v17 = vmul.f32 %v1109_v18, %v2008_v38  ;;  %v1262_v60 = vmul.f32 %v1109_v18, %v1887_v42  ;;  %v1148_v12 = vmul.f32 %v1109_v18, %v2075_v48  ;;  %v1187_v39 = vmul.f32 %v1109_v18, %v1952_v7 }
 0x2a9   :  { %1236 = vrot.lane.b32.xlu0 %v941_v30, %s1744_s23  ;;  %v959_v5 = vmul.f32 %v1109_v18, %v2033_v58  ;;  %v1229_v13 = vcombine.low %v1109_v18, %v1109_v18  ;;  %v1115_v38 = vcombine.high %v1109_v18, %v1109_v18  ;;  %v1073_v7 = vmul.f32 %v1109_v18, %v2113_v4  ;;  %v1734_v4 = vld [vmem:[%s2591_s0] sm:$0xff] }
 0x2aa   :  { %v1268_v42 = vcombine.high %v1262_v60, %v1262_v60  ;;  %v1193_v48 = vcombine.high %v1187_v39, %v1187_v39  ;;  %v1154_v44 = vcombine.low %v1148_v12, %v1148_v12  ;;  %v1040_v58 = vcombine.high %v1034_v17, %v1034_v17 }
 0x2ab   :  { %1198 = vrot.lane.b32.xlu1 %v1186_v57, %s1748_s27  ;;  %v1079_v28 = vcombine.low %v1073_v7, %v1073_v7  ;;  %v965_v54 = vcombine.high %v959_v5, %v959_v5 }
 0x2ad   :  { %1194 = vrot.lane.b32.xlu0 %v1185_v23, %s1748_s27 }
 0x2af   :  { %1234 = vrot.lane.b32.xlu1 %v1000_v24, %s1744_s23 }
 0x2b1   :  { %1118 = vrot.lane.b32.xlu0 %v1113_v22, %s1745_s24 }
 0x2b3   :  { %1045 = vrot.lane.b32.xlu1 %v1033_v26, %s1749_s28 }
 0x2b5   :  { %1157 = vrot.lane.b32.xlu0 %v1146_v29, %s1750_s29 }
 0x2b7   :  { %970 = vrot.lane.b32.xlu1 %v958_v49, %s1751_s30 }
 0x2b9   :  { %1082 = vrot.lane.b32.xlu0 %v1071_v34, %s1752_s14 }
 0x2bb   :  { %1006 = vrot.lane.b32.xlu1 %v1000_v24, %s1746_s25 }
 0x2bd   :  { %1041 = vrot.lane.b32.xlu0 %v1032_v40, %s1749_s28 }
 0x2bf   :  { %1122 = vrot.lane.b32.xlu1 %v1114_v6, %s1745_s24 }
 0x2c1   :  { %966 = vrot.lane.b32.xlu0 %v957_v16, %s1751_s30 }
 0x2c3   :  { %1161 = vrot.lane.b32.xlu1 %v1147_v31, %s1750_s29 }
 0x2c5   :  { %1273 = vrot.lane.b32.xlu0 %v1261_v1, %s1747_s26 }
 0x2c7   :  { %1086 = vrot.lane.b32.xlu1 %v1072_v14, %s1752_s14 }
 0x2c9   :  { %1196 = vrot.lane.b32.xlu0 %v1191_v15, %s1748_s27 }
 0x2cb   :  { %1271 = vrot.lane.b32.xlu1 %v1266_v45, %s1747_s26 }
 0x2cd   :  { %1043 = vrot.lane.b32.xlu0 %v1038_v25, %s1749_s28 }
 0x2cf   :  { %1155 = vrot.lane.b32.xlu1 %v1152_v2, %s1750_s29 }
 0x2d1   :  { %968 = vrot.lane.b32.xlu0 %v963_v20, %s1751_s30 }
 0x2d3   :  { %1080 = vrot.lane.b32.xlu1 %v1077_v61, %s1752_s14 }
 0x2d5   :  { %1275 = vrot.lane.b32.xlu0 %v1267_v59, %s1747_s26 }
 0x2d7   :  { %1159 = vrot.lane.b32.xlu1 %v1153_v43, %s1750_s29 }
 0x2d9   :  { %1200 = vrot.lane.b32.xlu0 %v1192_v33, %s1748_s27 }
 0x2db   :  { %1084 = vrot.lane.b32.xlu1 %v1078_v55, %s1752_s14 }
 0x2dd   :  { %1124 = vrot.lane.b32.xlu0 %v1109_v18, %s1745_s24 }
 0x2df   :  { %1047 = vrot.lane.b32.xlu1 %v1039_v36, %s1749_s28 }
 0x2e1   :  { %1240 = vrot.lane.b32.xlu0 %v1109_v18, %s1744_s23 }
 0x2e3   :  { %972 = vrot.lane.b32.xlu1 %v964_v35, %s1751_s30 }
 0x2e5   :  { %1049 = vrot.lane.b32.xlu0 %v1034_v17, %s1749_s28 }
 0x2e7   :  { %1277 = vrot.lane.b32.xlu1 %v1262_v60, %s1747_s26 }
 0x2e9   :  { %1165 = vrot.lane.b32.xlu0 %v1148_v12, %s1750_s29 }
 0x2eb   :  { %1202 = vrot.lane.b32.xlu1 %v1187_v39, %s1748_s27 }
 0x2ed   :  { %974 = vrot.lane.b32.xlu0 %v959_v5, %s1751_s30 }
 0x2ef   :  { %1238 = vrot.lane.b32.xlu1 %v1229_v13, %s1744_s23 }
 0x2f1   :  { %1010 = vrot.lane.b32.xlu0 %v1229_v13, %s1746_s25 }
 0x2f3   :  { %1126 = vrot.lane.b32.xlu1 %v1115_v38, %s1745_s24 }
 0x2f5   :  { %1279 = vrot.lane.b32.xlu0 %v1268_v42, %s1747_s26 }
 0x2f7   :  { %1204 = vrot.lane.b32.xlu1 %v1193_v48, %s1748_s27 }
 0x2f9   :  { %1163 = vrot.lane.b32.xlu0 %v1154_v44, %s1750_s29 }
 0x2fb   :  { %1051 = vrot.lane.b32.xlu1 %v1040_v58, %s1749_s28 }
 0x2fd   :  { %1088 = vrot.lane.b32.xlu0 %v1079_v28, %s1752_s14 }
 0x2ff   :  { %976 = vrot.lane.b32.xlu1 %v965_v54, %s1751_s30 }
 0x301   :  { %1090 = vrot.lane.b32.xlu0 %v1073_v7, %s1752_s14 }
 0x303   :  { %1325 = vperm.xlu1 %1720, %v1322_v37  }
 0x305   :  { %1012 = vrot.lane.b32.xlu0 %v1109_v18, %s1746_s25 }
 0x307   :  { %1578 = vrot.lane.b32.xlu1 %v1734_v4, %s1755_s20 }
 0x308   :  { %v1121_v46 = vpop.permute.xlu1 %1120 }
 0x309   :  { %1580 = vrot.lane.b32.xlu0 %v1735_v11, %s1755_s20 }
 0x30b   :  { %876 = vrot.lane.b32.xlu1 %v873_v10, %s1737_s16 }
 0x30c   :  { %v2412_v51 = vpop.permute.xlu1 %1008 }
 0x30f   :  { %v1233_v41 = vpop.permute.xlu0 %1232 }
 0x311   :  { %v1270_v62 = vpop.permute.xlu1 %1269 }
 0x313   :  { %v1117_v9 = vpop.permute.xlu0 %1116 }
 0x315   :  { %v1231_v30 = vpop.permute.xlu1 %1230 }
 0x316   :  { %v1242_v56 = vsel %vm502_vm14, %v1231_v30, %v1233_v41 }
 0x317   :  { %v1005_v8 = vpop.permute.xlu0 %1004  ;;  %1252 = vst [vmem:[#allocation3 + $0xa0] sm:$0xf0] %v1242_v56 }
 0x319   :  { %v1003_v63 = vpop.permute.xlu1 %1002 }
 0x31a   :  { %v1014_v52 = vsel %vm173_vm15, %v1003_v63, %v1005_v8 }
 0x31b   :  { %v2416_v53 = vpop.permute.xlu0 %1236  ;;  %1024 = vst [vmem:[#allocation3 + $0xb0] sm:$0xf0] %v1014_v52 }
 0x31d   :  { %v2418_v27 = vpop.permute.xlu1 %1198 }
 0x31f   :  { %v1195_v32 = vpop.permute.xlu0 %1194 }
 0x321   :  { %v1235_v57 = vpop.permute.xlu1 %1234 }
 0x322   :  { %v1243_v23 = vsel %vm502_vm14, %v1233_v41, %v1235_v57  ;;  %v1244_v24 = vsel %vm502_vm14, %v1235_v57, %v2416_v53 }
 0x323   :  { %v1119_v22 = vpop.permute.xlu0 %1118  ;;  %1253 = vst [vmem:[#allocation3 + $0x20] sm:$0xf0] %v1243_v23  ;;  %1254 = vst [vmem:[#allocation3 + $0x30] sm:$0xf0] %v1244_v24 }
 0x324   :  { %v1128_v26 = vsel %vm349_vm1, %v1117_v9, %v1119_v22  ;;  %v1129_v29 = vsel %vm349_vm1, %v1119_v22, %v1121_v46 }
 0x325   :  { %1138 = vst [vmem:[#allocation3 + $0xb8] sm:$0xf] %v1128_v26  ;;  %1139 = vst [vmem:[#allocation3 + $0x70] sm:$0xf] %v1129_v29  ;;  %v2425_v49 = vpop.permute.xlu1 %1045 }
 0x327   :  { %v1158_v34 = vpop.permute.xlu0 %1157 }
 0x329   :  { %v2427_v40 = vpop.permute.xlu1 %970 }
 0x32b   :  { %v1083_v6 = vpop.permute.xlu0 %1082 }
 0x32d   :  { %v1007_v16 = vpop.permute.xlu1 %1006 }
 0x32e   :  { %v1015_v31 = vsel %vm173_vm15, %v1005_v8, %v1007_v16  ;;  %v1016_v1 = vsel %vm173_vm15, %v1007_v16, %v2412_v51 }
 0x32f   :  { %v1042_v14 = vpop.permute.xlu0 %1041  ;;  %1025 = vst [vmem:[#allocation3] sm:$0xf0] %v1015_v31  ;;  %1026 = vst [vmem:[#allocation3 + $0x10] sm:$0xf0] %v1016_v1 }
 0x331   :  { %v1123_v15 = vpop.permute.xlu1 %1122 }
 0x332   :  { %v1130_v45 = vsel %vm349_vm1, %v1121_v46, %v1123_v15 }
 0x333   :  { %v967_v25 = vpop.permute.xlu0 %966  ;;  %1140 = vst [vmem:[#allocation3 + $0x18] sm:$0xf] %v1130_v45 }
 0x335   :  { %v2433_v2 = vpop.permute.xlu1 %1161 }
 0x337   :  { %v1274_v20 = vpop.permute.xlu0 %1273 }
 0x339   :  { %v2435_v61 = vpop.permute.xlu1 %1086 }
 0x33b   :  { %v1197_v59 = vpop.permute.xlu0 %1196 }
 0x33c   :  { %v1206_v43 = vsel %vm465_vm2, %v1195_v32, %v1197_v59  ;;  %v1207_v33 = vsel %vm465_vm2, %v1197_v59, %v2418_v27 }
 0x33d   :  { %1216 = vst [vmem:[#allocation3 + $0xa0] sm:$0xf] %v1206_v43  ;;  %1217 = vst [vmem:[#allocation3 + $0x20] sm:$0xf] %v1207_v33  ;;  %v1272_v55 = vpop.permute.xlu1 %1271 }
 0x33e   :  { %v1281_v18 = vsel %vm560_vm8, %v1270_v62, %v1272_v55  ;;  %v1282_v36 = vsel %vm560_vm8, %v1272_v55, %v1274_v20 }
 0x33f   :  { %v1044_v35 = vpop.permute.xlu0 %1043  ;;  %1291 = vst [vmem:[#allocation3 + $0x58] sm:$0xf] %v1281_v18  ;;  %1292 = vst [vmem:[#allocation3 + $0x50] sm:$0xf] %v1282_v36 }
 0x340   :  { %v1053_v17 = vsel %vm254_vm7, %v1042_v14, %v1044_v35  ;;  %v1054_v60 = vsel %vm254_vm7, %v1044_v35, %v2425_v49 }
 0x341   :  { %1063 = vst [vmem:[#allocation3 + $0x28] sm:$0xf] %v1053_v17  ;;  %1064 = vst [vmem:[#allocation3 + $0x40] sm:$0xf] %v1054_v60  ;;  %v1156_v12 = vpop.permute.xlu1 %1155 }
 0x342   :  { %v1167_v39 = vsel %vm407_vm3, %v1156_v12, %v1158_v34 }
 0x343   :  { %v969_v5 = vpop.permute.xlu0 %968  ;;  %1177 = vst [vmem:[#allocation3 + $0xb8] sm:$0xf0] %v1167_v39 }
 0x344   :  { %v978_v13 = vsel %vm136_vm9, %v967_v25, %v969_v5  ;;  %v979_v38 = vsel %vm136_vm9, %v969_v5, %v2427_v40  ;;  %v1313_v54 = vld [vmem:[#allocation3 + $0x20] sm:$0xff] }
 0x345   :  { %988 = vst [vmem:[#allocation3 + $0xb0] sm:$0xf] %v978_v13  ;;  %989 = vst [vmem:[#allocation3] sm:$0xf] %v979_v38  ;;  %v1081_v42 = vpop.permute.xlu1 %1080  ;;  %v1312_v4 = vld [vmem:[#allocation3 + $0xa0] sm:$0xff] }
 0x346   :  { %v1092_v48 = vsel %vm312_vm6, %v1081_v42, %v1083_v6  ;;  %v1318_v44 = vld [vmem:[#allocation3 + $0x50] sm:$0xf]  ;;  %v1317_v7 = vld [vmem:[#allocation3 + $0x58] sm:$0xf] }
 0x347   :  { %v1276_v58 = vpop.permute.xlu0 %1275  ;;  %1102 = vst [vmem:[#allocation3 + $0x28] sm:$0xf0] %v1092_v48  ;;  %1652 = vmatprep.subr.msk.mxu1 %vm46_vm0, %v1318_v44 }
 0x348   :  { %v1283_v28 = vsel %vm560_vm8, %v1274_v20, %v1276_v58  ;;  %1653 = vmatpush1.msk.msra.mxu1 %vm46_vm0, %v1317_v7 }
 0x349   :  { %1293 = vst [vmem:[#allocation3 + $0x8] sm:$0xf] %v1283_v28  ;;  %v1160_v37 = vpop.permute.xlu1 %1159  ;;  %1370 = vmatprep.subr.mxu1 %v1313_v54 }
 0x34a   :  { %v1168_v46 = vsel %vm407_vm3, %v1158_v34, %v1160_v37  ;;  %v1169_v10 = vsel %vm407_vm3, %v1160_v37, %v2433_v2  ;;  %1371 = vmatpush1.msra.mxu1 %v1312_v4 }
 0x34b   :  { %v1201_v11 = vpop.permute.xlu0 %1200  ;;  %1178 = vst [vmem:[#allocation3 + $0x70] sm:$0xf0] %v1168_v46  ;;  %1179 = vst [vmem:[#allocation3 + $0x18] sm:$0xf0] %v1169_v10 }
 0x34c   :  { %v1208_v41 = vsel %vm465_vm2, %v2418_v27, %v1201_v11  ;;  %v1307_v27 = vld [vmem:[#allocation3 + $0xb8] sm:$0xff]  ;;  %v1297_v31 = vld [vmem:[#allocation3 + $0xb0] sm:$0xff] }
 0x34d   :  { %1218 = vst [vmem:[#allocation3 + $0x30] sm:$0xf] %v1208_v41  ;;  %v1085_v62 = vpop.permute.xlu1 %1084 }
 0x34e   :  { %v1093_v9 = vsel %vm312_vm6, %v1083_v6, %v1085_v62  ;;  %v1094_v30 = vsel %vm312_vm6, %v1085_v62, %v2435_v61  ;;  %v1302_v29 = vld [vmem:[#allocation3 + $0x28] sm:$0xff]  ;;  %v1298_v6 = vld [vmem:[#allocation3] sm:$0xff] }
 0x34f   :  { %v1125_v56 = vpop.permute.xlu0 %1124  ;;  %1103 = vst [vmem:[#allocation3 + $0x40] sm:$0xf0] %v1093_v9  ;;  %1104 = vst [vmem:[#allocation3 + $0x78] sm:$0xf0] %v1094_v30 }
 0x350   :  { %v1131_v8 = vsel %vm349_vm1, %v1123_v15, %v1125_v56  ;;  %v1319_v18 = vld [vmem:[#allocation3 + $0x8] sm:$0xf] }
 0x351   :  { %1141 = vst [vmem:[#allocation3 + $0x68] sm:$0xf] %v1131_v8  ;;  %v1048_v63 = vpop.permute.xlu1 %1047 }
 0x352   :  { %v1055_v52 = vsel %vm254_vm7, %v2425_v49, %v1048_v63  ;;  %v1308_v32 = vld [vmem:[#allocation3 + $0x70] sm:$0xff]  ;;  %v2470_v49 = vld [vmem:[%s2596_s7] sm:$0xf] }
 0x353   :  { %v1241_v57 = vpop.permute.xlu0 %1240  ;;  %1065 = vst [vmem:[#allocation3 + $0x78] sm:$0xf] %v1055_v52  ;;  %1372 = vmatprep.subr.mxu1 %v1308_v32 }
 0x354   :  { %1373 = vmatpush1.msra.mxu1 %v1307_v27  ;;  %v1314_v38 = vld [vmem:[#allocation3 + $0x30] sm:$0xff] }
 0x355   :  { %v973_v23 = vpop.permute.xlu1 %972 }
 0x356   :  { %v980_v24 = vsel %vm136_vm9, %v2427_v40, %v973_v23  ;;  %v1303_v22 = vld [vmem:[#allocation3 + $0x40] sm:$0xff] }
 0x357   :  { %v1050_v26 = vpop.permute.xlu0 %1049  ;;  %990 = vst [vmem:[#allocation3 + $0x10] sm:$0xf] %v980_v24  ;;  %1374 = vmatprep.subr.mxu1 %v1303_v22 }
 0x358   :  { %v1056_v34 = vsel %vm254_vm7, %v1048_v63, %v1050_v26  ;;  %1375 = vmatpush1.msra.mxu1 %v1302_v29 }
 0x359   :  { %1066 = vst [vmem:[#allocation3 + $0x80] sm:$0xf] %v1056_v34  ;;  %v1278_v16 = vpop.permute.xlu1 %1277  ;;  %1376 = vmatprep.subr.mxu1 %v1298_v6 }
 0x35a   :  { %v1284_v40 = vsel %vm560_vm8, %v1276_v58, %v1278_v16  ;;  %1377 = vmatpush1.msra.mxu1 %v1297_v31  ;;  %v1304_v30 = vld [vmem:[#allocation3 + $0x78] sm:$0xff] }
 0x35b   :  { %v1166_v1 = vpop.permute.xlu0 %1165  ;;  %1294 = vst [vmem:[#allocation3 + $0xa8] sm:$0xf] %v1284_v40  ;;  %1654 = vmatmul.mubr.msk.f32.vlgmr.msra.gmra.mxu1 %vm608_vm10, %v2470_v49  ;;  %1687 = vmatprep.subr.mxu1 %v1736_v3 }
 0x35c   :  { %1697 = vmatprep.mubr.msk.f32.mxu1 %vm2607_vm5, %v1736_v3 }
 0x35d   :  { %v1203_v14 = vpop.permute.xlu1 %1202 }
 0x35e   :  { %v1209_v15 = vsel %vm465_vm2, %v1201_v11, %v1203_v14  ;;  %v1299_v8 = vld [vmem:[#allocation3 + $0x10] sm:$0xff] }
 0x35f   :  { %v975_v45 = vpop.permute.xlu0 %974  ;;  %1219 = vst [vmem:[#allocation3 + $0x90] sm:$0xf] %v1209_v15 }
 0x360   :  { %v981_v25 = vsel %vm136_vm9, %v973_v23, %v975_v45 }
 0x361   :  { %991 = vst [vmem:[#allocation3 + $0x48] sm:$0xf] %v981_v25  ;;  %v1239_v20 = vpop.permute.xlu1 %1238 }
 0x362   :  { %v1245_v59 = vsel %vm502_vm14, %v2416_v53, %v1239_v20  ;;  %v1246_v43 = vsel %vm502_vm14, %v1239_v20, %v1241_v57  ;;  %v1320_v33 = vld [vmem:[#allocation3 + $0xa8] sm:$0xf]  ;;  %vm2608_vm14 = vcmask 523264  }
 0x363   :  { %v1011_v55 = vpop.permute.xlu0 %1010  ;;  %1255 = vst [vmem:[#allocation3 + $0x90] sm:$0xf0] %v1245_v59  ;;  %1256 = vst [vmem:[#allocation3 + $0x38] sm:$0xf0] %v1246_v43  ;;  %1655 = vmatprep.subr.msk.mxu0 %vm46_vm0, %v1320_v33 }
 0x364   :  { %v1017_v36 = vsel %vm173_vm15, %v2412_v51, %v1011_v55  ;;  %1656 = vmatpush1.msk.msra.mxu0 %vm46_vm0, %v1319_v18 }
 0x365   :  { %1027 = vst [vmem:[#allocation3 + $0x48] sm:$0xf0] %v1017_v36  ;;  %v1127_v35 = vpop.permute.xlu1 %1126 }
 0x366   :  { %v1132_v17 = vsel %vm349_vm1, %v1125_v56, %v1127_v35 }
 0x367   :  { %v1280_v60 = vpop.permute.xlu0 %1279  ;;  %1142 = vst [vmem:[#allocation3 + $0x98] sm:$0xf] %v1132_v17 }
 0x368   :  { %v1285_v53 = vsel %vm560_vm8, %v1278_v16, %v1280_v60 }
 0x369   :  { %1295 = vst [vmem:[#allocation3 + $0xc0] sm:$0xf] %v1285_v53  ;;  %v1205_v12 = vpop.permute.xlu1 %1204 }
 0x36a   :  { %v1210_v39 = vsel %vm465_vm2, %v1203_v14, %v1205_v12  ;;  %v1315_v5 = vld [vmem:[#allocation3 + $0x90] sm:$0xff]  ;;  %vm2610_vm2 = vmmov %vm2608_vm14 }
 0x36b   :  { %v1164_v13 = vpop.permute.xlu0 %1163  ;;  %1220 = vst [vmem:[#allocation3 + $0x38] sm:$0xf] %v1210_v39  ;;  %1441 = vmatprep.subr.mxu0 %v1315_v5 }
 0x36c   :  { %v1170_v51 = vsel %vm407_vm3, %v2433_v2, %v1164_v13  ;;  %v1171_v42 = vsel %vm407_vm3, %v1164_v13, %v1166_v1  ;;  %1442 = vmatpush1.msra.mxu0 %v1314_v38  ;;  %v1300_v56 = vld [vmem:[#allocation3 + $0x48] sm:$0xff]  ;;  %v875_v1 = vrot.slane %v2316_v50, 4  ;;  %vm2611_vm3 = vmmov %vm2610_vm2 }
 0x36d   :  { %1180 = vst [vmem:[#allocation3 + $0x68] sm:$0xf0] %v1170_v51  ;;  %1181 = vst [vmem:[#allocation3 + $0x98] sm:$0xf0] %v1171_v42  ;;  %v1052_v48 = vpop.permute.xlu1 %1051  ;;  %v894_v51 = vld [vmem:[%s2598_s2] sm:$0xff] }
 0x36e   :  { %v1057_v44 = vsel %vm254_vm7, %v1050_v26, %v1052_v48  ;;  %v896_v48 = vsub.f32 1.0, %v894_v51 }
 0x36f   :  { %v1089_v7 = vpop.permute.xlu0 %1088  ;;  %1067 = vst [vmem:[#allocation3 + $0x88] sm:$0xf] %v1057_v44  ;;  %v891_v44 = vld [vmem:[%s2597_s1 + $0x8] sm:$0xff] }
 0x370   :  { %v1095_v58 = vsel %vm312_vm6, %v2435_v61, %v1089_v7  ;;  %v1321_v28 = vld [vmem:[#allocation3 + $0xc0] sm:$0xf]  ;;  %v1309_v61 = vld [vmem:[#allocation3 + $0x18] sm:$0xff] }
 0x371   :  { %1105 = vst [vmem:[#allocation3 + $0x80] sm:$0xf0] %v1095_v58  ;;  %1688 = vmatpush3.msk.msra.mxu1 %vm46_vm0, %v1321_v28  ;;  %v977_v54 = vpop.permute.xlu1 %976  ;;  %v893_v58 = vmul.f32 0.8, %v891_v44 }
 0x372   :  { %v982_v2 = vsel %vm136_vm9, %v975_v45, %v977_v54  ;;  %1689 = vmatprep.subr.mxu1 %v1736_v3  ;;  %v1316_v37 = vld [vmem:[#allocation3 + $0x38] sm:$0xff] }
 0x373   :  { %v1091_v4 = vpop.permute.xlu0 %1090  ;;  %992 = vst [vmem:[#allocation3 + $0x60] sm:$0xf] %v982_v2  ;;  %1690 = vmatpush3.msra.mxu1 %v1316_v37  ;;  %v1589_v2 = vld [vmem:[%s2599_s3] sm:$0xff]  ;;  %v1590_v37 = vld [vmem:[%s2599_s3 + $0x8] sm:$0xff] }
 0x374   :  { %v1096_v46 = vsel %vm312_vm6, %v1089_v7, %v1091_v4  ;;  %v1310_v10 = vld [vmem:[#allocation3 + $0x68] sm:$0xff]  ;;  %1691 = vmatprep.subr.mxu1 %v1736_v3  ;;  %v1311_v11 = vld [vmem:[#allocation3 + $0x98] sm:$0xff]  ;;  %v895_v7 = vld [vmem:[%s2598_s2 + $0x8] sm:$0xff] }
 0x375   :  { %1106 = vst [vmem:[#allocation3 + $0x88] sm:$0xf0] %v1096_v46  ;;  %1443 = vmatprep.subr.mxu0 %v1310_v10  ;;  %1692 = vmatpush3.msra.mxu1 %v1311_v11  ;;  %v897_v28 = vsub.f32 1.0, %v895_v7  ;;  %v1593_v4 = vld [vmem:[%s2600_s4] sm:$0xff]  ;;  %v1594_v46 = vld [vmem:[%s2600_s4 + $0x8] sm:$0xff] }
 0x376   :  { %1444 = vmatpush1.msra.mxu0 %v1309_v61  ;;  %1693 = vmatprep.subr.mxu1 %v1736_v3 }
 0x377   :  { %v1013_v41 = vpop.permute.xlu0 %1012 }
 0x378   :  { %v1018_v62 = vsel %vm173_vm15, %v1011_v55, %v1013_v41  ;;  %v1305_v9 = vld [vmem:[#allocation3 + $0x80] sm:$0xff]  ;;  %vm2609_vm15 = vmmov %vm2608_vm14  ;;  %v899_v41 = vmul.f32 %v897_v28, %v893_v58 }
 0x379   :  { %1028 = vst [vmem:[#allocation3 + $0x60] sm:$0xf0] %v1018_v62  ;;  %1445 = vmatprep.subr.mxu0 %v1305_v9  ;;  %v1591_v62 = vmul.f32 0.8, %v1589_v2 }
 0x37a   :  { %1446 = vmatpush1.msra.mxu0 %v1304_v30  ;;  %v1592_v30 = vmul.f32 0.8, %v1590_v37 }
 0x37b   :  { %1447 = vmatprep.subr.mxu0 %v1300_v56  ;;  %v1581_v15 = vpop.permute.xlu0 %1580  ;;  %v1595_v56 = vsub.f32 1.0, %v1593_v4 }
 0x37c   :  { %1448 = vmatpush1.msra.mxu0 %v1299_v8  ;;  %v1306_v63 = vld [vmem:[#allocation3 + $0x88] sm:$0xff]  ;;  %v1596_v8 = vsub.f32 1.0, %v1594_v46 }
 0x37d   :  { %1657 = vmatmul.mubr.msk.f32.vlgmr.msra.gmra.mxu0 %vm608_vm10, %v2470_v49  ;;  %1694 = vmatpush3.msra.mxu1 %v1306_v63 }
 0x37e   :  { %1695 = vmatprep.subr.mxu1 %v1736_v3  ;;  %v1326_v57 = vpop.permute.xlu1 %1325 }
 0x380   :  { %v1301_v52 = vld [vmem:[#allocation3 + $0x60] sm:$0xff] }
 0x381   :  { %1696 = vmatpush3.msra.mxu1 %v1301_v52 }
 0x382   :  { %1698 = vmatmul.mubr.msk.f32.vlgmr.msra.gmra.mxu1 %vm608_vm10, %v2470_v49  ;;  %v874_v49 = vrot.slane %v2301_v47, 4  ;;  %v1579_v14 = vpop.permute.xlu1 %1578 }
 0x386   :  { %v877_v45 = vpop.permute.xlu1 %876 }
 0x41b   :  { %v1412_v32 = vpop.f32.mrf.mxu1 }
 0x41c   :  { %v1413_v33 = vadd.f32 %v1412_v32, %v1326_v57 }
 0x41d   :  { %v1414_v22 = vpop.f32.mrf.mxu1 }
 0x41e   :  { %v1415_v53 = vadd.f32 %v1414_v22, %v1326_v57 }
 0x43d   :  { %v1483_v27 = vpop.f32.mrf.mxu0 }
 0x43e   :  { %v1484_v23 = vadd.f32 %v1483_v27, %v1326_v57 }
 0x43f   :  { %v1485_v24 = vpop.f32.mrf.mxu0 }
 0x440   :  { %v1561_v26 = vrot.slane %v1484_v23, 4  ;;  %v1486_v29 = vadd.f32 %v1485_v24, %v1326_v57  ;;  %v1598_v24 = vmul.f32 %v1596_v8, %v1592_v30 }
 0x442   :  { %v1562_v34 = vrot.slane %v1486_v29, 4  ;;  %1564 = vrot.lane.b32.xlu0 %v1561_v26, %s1737_s16  ;;  %v1554_v6 = vpop.f32.mrf.mxu1 }
 0x443   :  { %v1555_v16 = vadd.f32 %v1554_v6, %v1326_v57 }
 0x444   :  { %1566 = vrot.lane.b32.xlu1 %v1562_v34, %s1737_s16  ;;  %v1699_v31 = vpop.f32.mrf.mxu1 }
 0x445   :  { %v1563_v40 = vrot.slane %v1555_v16, 4 }
 0x447   :  { %1568 = vrot.lane.b32.xlu0 %v1563_v40, %s1737_s16 }
 0x448   :  { %880 = vrot.lane.b32.xlu1 %v875_v1, %s1737_s16 }
 0x44b   :  { %878 = vrot.lane.b32.xlu0 %v874_v49, %s1737_s16 }
 0x4b4   :  { %v1565_v25 = vpop.permute.xlu0 %1564 }
 0x4b6   :  { %v1567_v20 = vpop.permute.xlu1 %1566 }
 0x4b7   :  { %v1570_v43 = vsel %vm2608_vm14, %v1565_v25, %v1567_v20 }
 0x4b8   :  { %v1575_v35 = vsel %vm46_vm0, %v1413_v33, %v1570_v43 }
 0x4b9   :  { %v1569_v59 = vpop.permute.xlu0 %1568  ;;  %v1586_v12 = vadd.f32 %v1579_v14, %v1575_v35 }
 0x4ba   :  { %v881_v55 = vpop.permute.xlu1 %880  ;;  %v1571_v60 = vsel %vm2611_vm3, %v1567_v20, %v1569_v59  ;;  %v1577_v13 = vsel %vm46_vm0, %v1484_v23, %v1569_v59  ;;  %v1597_v23 = vmul.f32 %v1595_v56, %v1591_v62 }
 0x4bb   :  { %v889_v39 = vsel %vm46_vm0, %v2299_v21, %v881_v55  ;;  %v1576_v5 = vsel %vm46_vm0, %v1415_v53, %v1571_v60  ;;  %v1588_v38 = vadd.f32 %v1581_v15, %v1577_v13  ;;  %v890_v21 = vld [vmem:[%s2597_s1] sm:$0xff] }
 0x4bc   :  { %v892_v42 = vmul.f32 0.8, %v890_v21 }
 0x4bd   :  { %v879_v18 = vpop.permute.xlu0 %878 }
 0x4be   :  { %v882_v50 = vsel %vm2609_vm15, %v877_v45, %v879_v18  ;;  %v883_v36 = vsel %vm2610_vm2, %v879_v18, %v881_v55  ;;  %v898_v54 = vmul.f32 %v896_v48, %v892_v42 }
 0x4bf   :  { %v888_v47 = vsel %vm46_vm0, %v2310_v19, %v883_v36  ;;  %v887_v17 = vsel %vm46_vm0, %v2308_v0, %v882_v50  ;;  %v1582_v0 = vsel %vm938_vm13, %v1579_v14, %v1581_v15 }
 0x4c0   :  { %905 = vrot.lane.b32.xlu1 %v888_v47, %s1745_s24  ;;  %903 = vrot.lane.b32.xlu0 %v887_v17, %s1745_s24  ;;  %v1587_v19 = vadd.f32 %v1582_v0, %v1576_v5 }
 0x4c4   :  { %1602 = vrot.lane.b32.xlu1 %v1586_v12, %s1745_s24  ;;  %907 = vrot.lane.b32.xlu0 %v889_v39, %s1745_s24 }
 0x4c8   :  { %1606 = vrot.lane.b32.xlu1 %v1588_v38, %s1745_s24  ;;  %1604 = vrot.lane.b32.xlu0 %v1587_v19, %s1745_s24 }
 0x532   :  { %v906_v10 = vpop.permute.xlu1 %905  ;;  %v904_v11 = vpop.permute.xlu0 %903 }
 0x533   :  { %v909_v61 = vsel %vm349_vm1, %v904_v11, %v906_v10 }
 0x534   :  { %v913_v9 = vadd.f32 %v909_v61, %v898_v54 }
 0x536   :  { %vm915_vm0 = vcmp.gt.f32.partialorder %v913_v9, 0.5  ;;  %921 = vst [vmem:[%s2601_s10] sm:$0xff] %v913_v9  ;;  %v1603_v63 = vpop.permute.xlu1 %1602  ;;  %v908_v52 = vpop.permute.xlu0 %907 }
 0x537   :  { %v1650_v32 = vsel %vm915_vm0, 1.0, %v1736_v3  ;;  %v910_v57 = vsel %vm349_vm1, %v906_v10, %v908_v52 }
 0x538   :  { %923 = vst [vmem:[%s2602_s11] sm:$0xff] %v1650_v32  ;;  %v914_v27 = vadd.f32 %v910_v57, %v899_v41 }
 0x53a   :  { %vm916_vm6 = vcmp.gt.f32.partialorder %v914_v27, 0.5  ;;  %922 = vst [vmem:[%s2601_s10 + $0x8] sm:$0xff] %v914_v27  ;;  %v1607_v22 = vpop.permute.xlu1 %1606  ;;  %v1605_v26 = vpop.permute.xlu0 %1604 }
 0x53b   :  { %v1651_v29 = vsel %vm916_vm6, 1.0, %v1736_v3  ;;  %v1608_v34 = vsel %vm349_vm1, %v1603_v63, %v1605_v26  ;;  %v1609_v6 = vsel %vm349_vm1, %v1605_v26, %v1607_v22 }
 0x53c   :  { %924 = vst [vmem:[%s2602_s11 + $0x8] sm:$0xff] %v1651_v29  ;;  %v1612_v16 = vadd.f32 %v1608_v34, %v1597_v23  ;;  %v1613_v31 = vadd.f32 %v1609_v6, %v1598_v24 }
 0x53e   :  { %vm1614_vm7 = vcmp.gt.f32.partialorder %v1612_v16, 0.5  ;;  %vm1615_vm8 = vcmp.gt.f32.partialorder %v1613_v31, 0.5  ;;  %1620 = vst [vmem:[%s2603_s12] sm:$0xff] %v1612_v16  ;;  %1621 = vst [vmem:[%s2603_s12 + $0x8] sm:$0xff] %v1613_v31 }
 0x53f   :  { %v1660_v40 = vsel %vm1614_vm7, 1.0, %v1736_v3  ;;  %v1661_v1 = vsel %vm1615_vm8, 1.0, %v1736_v3 }
 0x540   :  { %1622 = vst [vmem:[%s2604_s13] sm:$0xff] %v1660_v40  ;;  %1623 = vst [vmem:[%s2604_s13 + $0x8] sm:$0xff] %v1661_v1 }

</bundles_post_ra>
